<compile_context>
chip_gen: v7x
topology: tpu7x:2x2x1
jax: 0.10.0
libtpu: 0.0.40
codegen_flags: <defaults>
</compile_context>

<pallas_src>
import jax
import jax.numpy as jnp
from jax import lax
from jax.experimental import pallas as pl
from jax.experimental.pallas import tpu as pltpu

_BN_EPS = 1e-5


def _pointcloud_ae_kernel(x_ref,
                          w1_ref, b1_ref, w2_ref, b2_ref, w3_ref, b3_ref,
                          wd1_ref, bd1_ref, wd2_ref, bd2_ref, wd3_ref, bd3_ref,
                          out_ref, acc_ref):
    """One (batch-tile, point-tile) grid step.

    x_ref:  (TB, 3, TN) f32, channels-first (points on lanes).
    acc_ref: (L, TB) f32 scratch — running max over point tiles, per batch row.
    out_ref: (TB, 3*N) f32 — written only on the last point step.
    """
    n = pl.program_id(1)
    n_last = pl.num_programs(1) - 1

    @pl.when(n == 0)
    def _init():
        # conv3 has no ReLU -> max-pool accumulator must start at -inf.
        acc_ref[...] = jnp.full_like(acc_ref, -jnp.inf)

    tb = x_ref.shape[0]

    # Hoist weight/bias loads out of the per-batch loop.
    w1 = w1_ref[...]                               # (64, 3)  f32
    w1c0, w1c1, w1c2 = w1[:, 0:1], w1[:, 1:2], w1[:, 2:3]
    b1 = b1_ref[...]                               # (64, 1)  f32
    w2 = w2_ref[...]                               # (128, 64) bf16
    b2 = b2_ref[...]                               # (128, 1) f32
    w3 = w3_ref[...]                               # (L, 128) bf16
    b3 = b3_ref[...]                               # (L, 1)   f32

    for b in range(tb):
        xb = x_ref[b]                              # (3, TN), points lane-dense
        # conv1+bn1+relu: K=3 is too small for the MXU -> VPU broadcast-FMAs.
        h = w1c0 * xb[0:1, :] + w1c1 * xb[1:2, :] + w1c2 * xb[2:3, :]
        h = jnp.maximum(h + b1, 0.0)               # (64, TN)
        # conv2+bn2+relu: MXU, bf16 inputs / f32 accumulation.
        h = jnp.dot(w2, h.astype(jnp.bfloat16),
                    preferred_element_type=jnp.float32)
        h = jnp.maximum(h + b2, 0.0)               # (128, TN)
        # conv3+bn3 (no relu).
        h = jnp.dot(w3, h.astype(jnp.bfloat16),
                    preferred_element_type=jnp.float32) + b3   # (L, TN)
        # Partial max-pool over this point tile (cross-lane reduce on XLU).
        zb = jnp.max(h, axis=1, keepdims=True)     # (L, 1)
        acc_ref[:, b:b + 1] = jnp.maximum(acc_ref[:, b:b + 1], zb)

    @pl.when(n == n_last)
    def _decode():
        # z is (L, TB); contract dim 0 of both operands (implicit z^T) so no
        # explicit transpose op is needed -> (TB, 256).
        z = acc_ref[...].astype(jnp.bfloat16)
        d = lax.dot_general(z, wd1_ref[...],
                            dimension_numbers=(((0,), (0,)), ((), ())),
                            preferred_element_type=jnp.float32)
        d = jnp.maximum(d + bd1_ref[...], 0.0)
        d = jnp.dot(d.astype(jnp.bfloat16), wd2_ref[...],
                    preferred_element_type=jnp.float32)
        d = jnp.maximum(d + bd2_ref[...], 0.0)
        out_ref[...] = (jnp.dot(d.astype(jnp.bfloat16), wd3_ref[...],
                                preferred_element_type=jnp.float32)
                        + bd3_ref[...])


def _pick_tile(total, prefs):
    for p in prefs:
        if total >= p and total % p == 0:
            return p
    return total


def pointcloud_ae_forward(x_ncw, kernel_params, point_size, latent_size):
    """x_ncw: (B, 3, point_size) float32, native PyTorch Conv1d layout."""
    B, C, N = x_ncw.shape
    assert C == 3 and N == point_size
    x = x_ncw.astype(jnp.float32)

    TN = _pick_tile(N, (512, 256, 128))   # point tile (lane dim of x block)
    TB = _pick_tile(B, (32, 16, 8))       # batch tile (decoder MXU M dim)
    grid = (B // TB, N // TN)

    const2 = lambda b, n: (0, 0)          # weights stay VMEM-resident
    in_specs = [pl.BlockSpec((TB, 3, TN), lambda b, n: (b, 0, n))]
    in_specs += [pl.BlockSpec(p.shape, const2) for p in kernel_params]
    out_specs = pl.BlockSpec((TB, 3 * point_size), lambda b, n: (b, 0))

    flops = (2 * B * N * (3 * 64 + 64 * 128 + 128 * latent_size)
             + 2 * B * (latent_size * 256 + 256 * 256 + 256 * 3 * N))
    bytes_accessed = (int(x.size) * 4
                      + sum(int(p.size) * p.dtype.itemsize for p in kernel_params)
                      + B * 3 * N * 4)

    out = pl.pallas_call(
        _pointcloud_ae_kernel,
        out_shape=jax.ShapeDtypeStruct((B, 3 * point_size), jnp.float32),
        grid_spec=pltpu.PrefetchScalarGridSpec(
            num_scalar_prefetch=0,
            grid=grid,
            in_specs=in_specs,
            out_specs=out_specs,
            scratch_shapes=[pltpu.VMEM((latent_size, TB), jnp.float32)],
        ),
        compiler_params=pltpu.CompilerParams(
            dimension_semantics=("parallel", "arbitrary"),
            vmem_limit_bytes=32 * 1024 * 1024,
        ),
        cost_estimate=pl.CostEstimate(flops=flops, transcendentals=0,
                                      bytes_accessed=bytes_accessed),
    )(x, *kernel_params)
    return out.reshape(B, point_size, 3)


# -------------------- parameter setup (plain JAX glue) --------------------

def init_raw_params(key, point_size, latent_size):
    """Deterministic synthetic parameters matching the PyTorch module shapes."""
    ks = iter(jax.random.split(key, 32))

    def conv_bn(cin, cout):
        return dict(
            w=0.2 * jax.random.normal(next(ks), (cout, cin), jnp.float32),
            b=0.1 * jax.random.normal(next(ks), (cout,), jnp.float32),
            gamma=1.0 + 0.1 * jax.random.normal(next(ks), (cout,), jnp.float32),
            beta=0.1 * jax.random.normal(next(ks), (cout,), jnp.float32),
            mean=0.1 * jax.random.normal(next(ks), (cout,), jnp.float32),
            var=1.0 + 0.1 * jax.random.uniform(next(ks), (cout,), jnp.float32),
        )

    def linear(cin, cout):
        return dict(
            w=0.2 * jax.random.normal(next(ks), (cout, cin), jnp.float32),
            b=0.1 * jax.random.normal(next(ks), (cout,), jnp.float32),
        )

    return dict(
        conv1=conv_bn(3, 64),
        conv2=conv_bn(64, 128),
        conv3=conv_bn(128, latent_size),
        dec1=linear(latent_size, 256),
        dec2=linear(256, 256),
        dec3=linear(256, point_size * 3),
    )


def fold_params(raw):
    """Fold eval-mode BN into the convs; lay out weights for the kernel.

    Encoder weights stay channels-first (Cout, Cin); decoder weights are
    (Cin, Cout).  MXU operands (conv2/conv3/decoder weights) are bf16; conv1
    (VPU path) and all biases stay f32.
    """
    def bn_fold(p):
        s = p["gamma"] / jnp.sqrt(p["var"] + _BN_EPS)
        w_eff = s[:, None] * p["w"]                                # (Cout, Cin)
        b_eff = (s * (p["b"] - p["mean"]) + p["beta"])[:, None]    # (Cout, 1)
        return w_eff, b_eff

    out = []
    w1, b1 = bn_fold(raw["conv1"])
    out += [w1.astype(jnp.float32), b1.astype(jnp.float32)]
    w2, b2 = bn_fold(raw["conv2"])
    out += [w2.astype(jnp.bfloat16), b2.astype(jnp.float32)]
    w3, b3 = bn_fold(raw["conv3"])
    out += [w3.astype(jnp.bfloat16), b3.astype(jnp.float32)]
    for name in ("dec1", "dec2", "dec3"):
        p = raw[name]
        out += [p["w"].T.astype(jnp.bfloat16),
                p["b"][None, :].astype(jnp.float32)]
    return out


# -------------------- pure-JAX reference (for verification) --------------------

def reference_forward(x_ncw, raw, point_size, latent_size):
    x = x_ncw.astype(jnp.float32)                                  # (B, 3, N)

    def conv_bn_block(x, p, relu):
        y = jnp.einsum("oc,bcn->bon", p["w"], x) + p["b"][None, :, None]
        y = (y - p["mean"][None, :, None]) / jnp.sqrt(p["var"][None, :, None] + _BN_EPS)
        y = y * p["gamma"][None, :, None] + p["beta"][None, :, None]
        return jnp.maximum(y, 0.0) if relu else y

    h = conv_bn_block(x, raw["conv1"], True)
    h = conv_bn_block(h, raw["conv2"], True)
    h = conv_bn_block(h, raw["conv3"], False)
    z = jnp.max(h, axis=2)                                         # (B, L)
    d = jnp.maximum(z @ raw["dec1"]["w"].T + raw["dec1"]["b"], 0.0)
    d = jnp.maximum(d @ raw["dec2"]["w"].T + raw["dec2"]["b"], 0.0)
    d = d @ raw["dec3"]["w"].T + raw["dec3"]["b"]
    return d.reshape(-1, point_size, 3)


if __name__ == "__main__":
    B, point_size, latent_size = 2, 16, 32

    key = jax.random.PRNGKey(0)
    k_x, k_p = jax.random.split(key)
    x = jax.random.normal(k_x, (B, 3, point_size), jnp.float32)    # PyTorch NCW input

    raw = init_raw_params(k_p, point_size, latent_size)
    kernel_params = fold_params(raw)

    out = pointcloud_ae_forward(x, kernel_params, point_size, latent_size)
    out = jax.block_until_ready(out)

    ref = reference_forward(x, raw, point_size, latent_size)
    assert out.shape == (B, point_size, 3)
    rel_err = float(jnp.max(jnp.abs(out - ref)) / (jnp.max(jnp.abs(ref)) + 1e-6))
    assert rel_err < 3e-2, f"mismatch vs reference: rel_err={rel_err}"

    print("KERNEL_OK")
</pallas_src>

<mosaic_0001>
module attributes {stable_mosaic.version = 11 : i64} {
  func.func @_pointcloud_ae_kernel(%arg0: i32, %arg1: i32, %arg2: memref<2x3x16xf32, #tpu.memory_space<vmem>>, %arg3: memref<64x3xf32, #tpu.memory_space<vmem>>, %arg4: memref<64x1xf32, #tpu.memory_space<vmem>>, %arg5: memref<128x64xbf16, #tpu.memory_space<vmem>>, %arg6: memref<128x1xf32, #tpu.memory_space<vmem>>, %arg7: memref<32x128xbf16, #tpu.memory_space<vmem>>, %arg8: memref<32x1xf32, #tpu.memory_space<vmem>>, %arg9: memref<32x256xbf16, #tpu.memory_space<vmem>>, %arg10: memref<1x256xf32, #tpu.memory_space<vmem>>, %arg11: memref<256x256xbf16, #tpu.memory_space<vmem>>, %arg12: memref<1x256xf32, #tpu.memory_space<vmem>>, %arg13: memref<256x48xbf16, #tpu.memory_space<vmem>>, %arg14: memref<1x48xf32, #tpu.memory_space<vmem>>, %arg15: memref<2x48xf32, #tpu.memory_space<vmem>>, %arg16: memref<32x2xf32, #tpu.memory_space<vmem>>) attributes {dimension_semantics = [#tpu.dimension_semantics<parallel>, #tpu.dimension_semantics<arbitrary>], iteration_bounds = array<i64: 1, 1>, scalar_prefetch = 0 : i64, scratch_operands = 1 : i64, tpu.core_type = #tpu.core_type<tc>, window_params = [{transform_indices = @transform_0, window_bounds = array<i64: 2, 3, 16>}, {pipeline_mode = #tpu.pipeline_mode<synchronous>, transform_indices = @transform_1, window_bounds = array<i64: 64, 3>}, {pipeline_mode = #tpu.pipeline_mode<synchronous>, transform_indices = @transform_2, window_bounds = array<i64: 64, 1>}, {pipeline_mode = #tpu.pipeline_mode<synchronous>, transform_indices = @transform_3, window_bounds = array<i64: 128, 64>}, {pipeline_mode = #tpu.pipeline_mode<synchronous>, transform_indices = @transform_4, window_bounds = array<i64: 128, 1>}, {pipeline_mode = #tpu.pipeline_mode<synchronous>, transform_indices = @transform_5, window_bounds = array<i64: 32, 128>}, {pipeline_mode = #tpu.pipeline_mode<synchronous>, transform_indices = @transform_6, window_bounds = array<i64: 32, 1>}, {pipeline_mode = #tpu.pipeline_mode<synchronous>, transform_indices = @transform_7, window_bounds = array<i64: 32, 256>}, {pipeline_mode = #tpu.pipeline_mode<synchronous>, transform_indices = @transform_8, window_bounds = array<i64: 1, 256>}, {pipeline_mode = #tpu.pipeline_mode<synchronous>, transform_indices = @transform_9, window_bounds = array<i64: 256, 256>}, {pipeline_mode = #tpu.pipeline_mode<synchronous>, transform_indices = @transform_10, window_bounds = array<i64: 1, 256>}, {pipeline_mode = #tpu.pipeline_mode<synchronous>, transform_indices = @transform_11, window_bounds = array<i64: 256, 48>}, {pipeline_mode = #tpu.pipeline_mode<synchronous>, transform_indices = @transform_12, window_bounds = array<i64: 1, 48>}, {transform_indices = @transform_13, window_bounds = array<i64: 2, 48>}]} {
    %c0_i32 = arith.constant 0 : i32
    %0 = arith.cmpi eq, %arg1, %c0_i32 : i32
    %1 = arith.extui %0 : i1 to i32
    %c0_i32_0 = arith.constant 0 : i32
    %2 = arith.cmpi ne, %1, %c0_i32_0 : i32
    scf.if %2 {
      %cst_36 = arith.constant 0xFF800000 : f32
      %85 = vector.broadcast %cst_36 : f32 to vector<32x2xf32>
      %c0_37 = arith.constant 0 : index
      %c0_38 = arith.constant 0 : index
      %86 = vector.load %arg16[%c0_37, %c0_38] : memref<32x2xf32, #tpu.memory_space<vmem>>, vector<32x2xf32>
      tpu.vector_store %arg16[%c0_37, %c0_38], %85 {strides = array<i32>} : memref<32x2xf32, #tpu.memory_space<vmem>>, vector<32x2xf32>,
    } else {
    }
    %c0 = arith.constant 0 : index
    %c0_1 = arith.constant 0 : index
    %3 = vector.load %arg3[%c0, %c0_1] : memref<64x3xf32, #tpu.memory_space<vmem>>, vector<64x3xf32>
    %4 = vector.extract_strided_slice %3 {offsets = [0, 0], sizes = [64, 1], strides = [1, 1]} : vector<64x3xf32> to vector<64x1xf32>
    %5 = vector.extract_strided_slice %3 {offsets = [0, 1], sizes = [64, 1], strides = [1, 1]} : vector<64x3xf32> to vector<64x1xf32>
    %6 = vector.extract_strided_slice %3 {offsets = [0, 2], sizes = [64, 1], strides = [1, 1]} : vector<64x3xf32> to vector<64x1xf32>
    %c0_2 = arith.constant 0 : index
    %c0_3 = arith.constant 0 : index
    %7 = vector.load %arg4[%c0_2, %c0_3] : memref<64x1xf32, #tpu.memory_space<vmem>>, vector<64x1xf32>
    %c0_4 = arith.constant 0 : index
    %c0_5 = arith.constant 0 : index
    %8 = vector.load %arg5[%c0_4, %c0_5] : memref<128x64xbf16, #tpu.memory_space<vmem>>, vector<128x64xbf16>
    %c0_6 = arith.constant 0 : index
    %c0_7 = arith.constant 0 : index
    %9 = vector.load %arg6[%c0_6, %c0_7] : memref<128x1xf32, #tpu.memory_space<vmem>>, vector<128x1xf32>
    %c0_8 = arith.constant 0 : index
    %c0_9 = arith.constant 0 : index
    %10 = vector.load %arg7[%c0_8, %c0_9] : memref<32x128xbf16, #tpu.memory_space<vmem>>, vector<32x128xbf16>
    %c0_10 = arith.constant 0 : index
    %c0_11 = arith.constant 0 : index
    %11 = vector.load %arg8[%c0_10, %c0_11] : memref<32x1xf32, #tpu.memory_space<vmem>>, vector<32x1xf32>
    %c0_12 = arith.constant 0 : index
    %c0_13 = arith.constant 0 : index
    %c0_14 = arith.constant 0 : index
    %12 = vector.load %arg2[%c0_12, %c0_13, %c0_14] : memref<2x3x16xf32, #tpu.memory_space<vmem>>, vector<1x3x16xf32>
    %13 = vector.shape_cast %12 : vector<1x3x16xf32> to vector<3x16xf32>
    %14 = vector.extract_strided_slice %13 {offsets = [0, 0], sizes = [1, 16], strides = [1, 1]} : vector<3x16xf32> to vector<1x16xf32>
    %15 = vector.broadcast %4 : vector<64x1xf32> to vector<64x16xf32>
    %16 = vector.broadcast %14 : vector<1x16xf32> to vector<64x16xf32>
    %17 = arith.mulf %15, %16 : vector<64x16xf32>
    %18 = vector.extract_strided_slice %13 {offsets = [1, 0], sizes = [1, 16], strides = [1, 1]} : vector<3x16xf32> to vector<1x16xf32>
    %19 = vector.broadcast %5 : vector<64x1xf32> to vector<64x16xf32>
    %20 = vector.broadcast %18 : vector<1x16xf32> to vector<64x16xf32>
    %21 = arith.mulf %19, %20 : vector<64x16xf32>
    %22 = arith.addf %17, %21 : vector<64x16xf32>
    %23 = vector.extract_strided_slice %13 {offsets = [2, 0], sizes = [1, 16], strides = [1, 1]} : vector<3x16xf32> to vector<1x16xf32>
    %24 = vector.broadcast %6 : vector<64x1xf32> to vector<64x16xf32>
    %25 = vector.broadcast %23 : vector<1x16xf32> to vector<64x16xf32>
    %26 = arith.mulf %24, %25 : vector<64x16xf32>
    %27 = arith.addf %22, %26 : vector<64x16xf32>
    %28 = vector.broadcast %7 : vector<64x1xf32> to vector<64x16xf32>
    %29 = arith.addf %27, %28 : vector<64x16xf32>
    %cst = arith.constant 0.000000e+00 : f32
    %30 = vector.broadcast %cst : f32 to vector<64x16xf32>
    %31 = arith.maximumf %29, %30 : vector<64x16xf32>
    %32 = arith.truncf %31 : vector<64x16xf32> to vector<64x16xbf16>
    %cst_15 = arith.constant dense<0.000000e+00> : vector<128x16xf32>
    %33 = tpu.matmul %8, %32, %cst_15 {dimension_numbers = #tpu.dot_dimension_numbers<[1], [0], [0], [1], [0, 0, 1, 1], [], []>} : vector<128x64xbf16>, vector<64x16xbf16>, vector<128x16xf32> -> vector<128x16xf32>
    %34 = vector.broadcast %9 : vector<128x1xf32> to vector<128x16xf32>
    %35 = arith.addf %33, %34 : vector<128x16xf32>
    %cst_16 = arith.constant 0.000000e+00 : f32
    %36 = vector.broadcast %cst_16 : f32 to vector<128x16xf32>
    %37 = arith.maximumf %35, %36 : vector<128x16xf32>
    %38 = arith.truncf %37 : vector<128x16xf32> to vector<128x16xbf16>
    %cst_17 = arith.constant dense<0.000000e+00> : vector<32x16xf32>
    %39 = tpu.matmul %10, %38, %cst_17 {dimension_numbers = #tpu.dot_dimension_numbers<[1], [0], [0], [1], [0, 0, 1, 1], [], []>} : vector<32x128xbf16>, vector<128x16xbf16>, vector<32x16xf32> -> vector<32x16xf32>
    %40 = vector.broadcast %11 : vector<32x1xf32> to vector<32x16xf32>
    %41 = arith.addf %39, %40 : vector<32x16xf32>
    %cst_18 = arith.constant dense<0xFF800000> : vector<32xf32>
    %42 = vector.multi_reduction <maximumf>, %41, %cst_18 [1] : vector<32x16xf32> to vector<32xf32>
    %43 = vector.shape_cast %42 : vector<32xf32> to vector<32x1xf32>
    %c0_19 = arith.constant 0 : index
    %c0_20 = arith.constant 0 : index
    %44 = vector.load %arg16[%c0_19, %c0_20] : memref<32x2xf32, #tpu.memory_space<vmem>>, vector<32x1xf32>
    %45 = arith.maximumf %44, %43 : vector<32x1xf32>
    %c0_21 = arith.constant 0 : index
    %c0_22 = arith.constant 0 : index
    %46 = vector.load %arg16[%c0_21, %c0_22] : memref<32x2xf32, #tpu.memory_space<vmem>>, vector<32x1xf32>
    tpu.vector_store %arg16[%c0_21, %c0_22], %45 {strides = array<i32>} : memref<32x2xf32, #tpu.memory_space<vmem>>, vector<32x1xf32>,
    %c1 = arith.constant 1 : index
    %c0_23 = arith.constant 0 : index
    %c0_24 = arith.constant 0 : index
    %47 = vector.load %arg2[%c1, %c0_23, %c0_24] : memref<2x3x16xf32, #tpu.memory_space<vmem>>, vector<1x3x16xf32>
    %48 = vector.shape_cast %47 : vector<1x3x16xf32> to vector<3x16xf32>
    %49 = vector.extract_strided_slice %48 {offsets = [0, 0], sizes = [1, 16], strides = [1, 1]} : vector<3x16xf32> to vector<1x16xf32>
    %50 = vector.broadcast %4 : vector<64x1xf32> to vector<64x16xf32>
    %51 = vector.broadcast %49 : vector<1x16xf32> to vector<64x16xf32>
    %52 = arith.mulf %50, %51 : vector<64x16xf32>
    %53 = vector.extract_strided_slice %48 {offsets = [1, 0], sizes = [1, 16], strides = [1, 1]} : vector<3x16xf32> to vector<1x16xf32>
    %54 = vector.broadcast %5 : vector<64x1xf32> to vector<64x16xf32>
    %55 = vector.broadcast %53 : vector<1x16xf32> to vector<64x16xf32>
    %56 = arith.mulf %54, %55 : vector<64x16xf32>
    %57 = arith.addf %52, %56 : vector<64x16xf32>
    %58 = vector.extract_strided_slice %48 {offsets = [2, 0], sizes = [1, 16], strides = [1, 1]} : vector<3x16xf32> to vector<1x16xf32>
    %59 = vector.broadcast %6 : vector<64x1xf32> to vector<64x16xf32>
    %60 = vector.broadcast %58 : vector<1x16xf32> to vector<64x16xf32>
    %61 = arith.mulf %59, %60 : vector<64x16xf32>
    %62 = arith.addf %57, %61 : vector<64x16xf32>
    %63 = vector.broadcast %7 : vector<64x1xf32> to vector<64x16xf32>
    %64 = arith.addf %62, %63 : vector<64x16xf32>
    %cst_25 = arith.constant 0.000000e+00 : f32
    %65 = vector.broadcast %cst_25 : f32 to vector<64x16xf32>
    %66 = arith.maximumf %64, %65 : vector<64x16xf32>
    %67 = arith.truncf %66 : vector<64x16xf32> to vector<64x16xbf16>
    %cst_26 = arith.constant dense<0.000000e+00> : vector<128x16xf32>
    %68 = tpu.matmul %8, %67, %cst_26 {dimension_numbers = #tpu.dot_dimension_numbers<[1], [0], [0], [1], [0, 0, 1, 1], [], []>} : vector<128x64xbf16>, vector<64x16xbf16>, vector<128x16xf32> -> vector<128x16xf32>
    %69 = vector.broadcast %9 : vector<128x1xf32> to vector<128x16xf32>
    %70 = arith.addf %68, %69 : vector<128x16xf32>
    %cst_27 = arith.constant 0.000000e+00 : f32
    %71 = vector.broadcast %cst_27 : f32 to vector<128x16xf32>
    %72 = arith.maximumf %70, %71 : vector<128x16xf32>
    %73 = arith.truncf %72 : vector<128x16xf32> to vector<128x16xbf16>
    %cst_28 = arith.constant dense<0.000000e+00> : vector<32x16xf32>
    %74 = tpu.matmul %10, %73, %cst_28 {dimension_numbers = #tpu.dot_dimension_numbers<[1], [0], [0], [1], [0, 0, 1, 1], [], []>} : vector<32x128xbf16>, vector<128x16xbf16>, vector<32x16xf32> -> vector<32x16xf32>
    %75 = vector.broadcast %11 : vector<32x1xf32> to vector<32x16xf32>
    %76 = arith.addf %74, %75 : vector<32x16xf32>
    %cst_29 = arith.constant dense<0xFF800000> : vector<32xf32>
    %77 = vector.multi_reduction <maximumf>, %76, %cst_29 [1] : vector<32x16xf32> to vector<32xf32>
    %78 = vector.shape_cast %77 : vector<32xf32> to vector<32x1xf32>
    %c0_30 = arith.constant 0 : index
    %c1_31 = arith.constant 1 : index
    %79 = vector.load %arg16[%c0_30, %c1_31] : memref<32x2xf32, #tpu.memory_space<vmem>>, vector<32x1xf32>
    %80 = arith.maximumf %79, %78 : vector<32x1xf32>
    %c0_32 = arith.constant 0 : index
    %c1_33 = arith.constant 1 : index
    %81 = vector.load %arg16[%c0_32, %c1_33] : memref<32x2xf32, #tpu.memory_space<vmem>>, vector<32x1xf32>
    tpu.vector_store %arg16[%c0_32, %c1_33], %80 {strides = array<i32>} : memref<32x2xf32, #tpu.memory_space<vmem>>, vector<32x1xf32>,
    %c0_i32_34 = arith.constant 0 : i32
    %82 = arith.cmpi eq, %arg1, %c0_i32_34 : i32
    %83 = arith.extui %82 : i1 to i32
    %c0_i32_35 = arith.constant 0 : i32
    %84 = arith.cmpi ne, %83, %c0_i32_35 : i32
    scf.if %84 {
      %c0_36 = arith.constant 0 : index
      %c0_37 = arith.constant 0 : index
      %85 = vector.load %arg16[%c0_36, %c0_37] : memref<32x2xf32, #tpu.memory_space<vmem>>, vector<32x2xf32>
      %86 = arith.truncf %85 : vector<32x2xf32> to vector<32x2xbf16>
      %c0_38 = arith.constant 0 : index
      %c0_39 = arith.constant 0 : index
      %87 = vector.load %arg9[%c0_38, %c0_39] : memref<32x256xbf16, #tpu.memory_space<vmem>>, vector<32x256xbf16>
      %cst_40 = arith.constant dense<0.000000e+00> : vector<2x256xf32>
      %88 = tpu.matmul %86, %87, %cst_40 {dimension_numbers = #tpu.dot_dimension_numbers<[0], [0], [1], [1], [0, 1, 1, 1], [], []>} : vector<32x2xbf16>, vector<32x256xbf16>, vector<2x256xf32> -> vector<2x256xf32>
      %c0_41 = arith.constant 0 : index
      %c0_42 = arith.constant 0 : index
      %89 = vector.load %arg10[%c0_41, %c0_42] : memref<1x256xf32, #tpu.memory_space<vmem>>, vector<1x256xf32>
      %90 = vector.broadcast %89 : vector<1x256xf32> to vector<2x256xf32>
      %91 = arith.addf %88, %90 : vector<2x256xf32>
      %cst_43 = arith.constant 0.000000e+00 : f32
      %92 = vector.broadcast %cst_43 : f32 to vector<2x256xf32>
      %93 = arith.maximumf %91, %92 : vector<2x256xf32>
      %94 = arith.truncf %93 : vector<2x256xf32> to vector<2x256xbf16>
      %c0_44 = arith.constant 0 : index
      %c0_45 = arith.constant 0 : index
      %95 = vector.load %arg11[%c0_44, %c0_45] : memref<256x256xbf16, #tpu.memory_space<vmem>>, vector<256x256xbf16>
      %cst_46 = arith.constant dense<0.000000e+00> : vector<2x256xf32>
      %96 = tpu.matmul %94, %95, %cst_46 {dimension_numbers = #tpu.dot_dimension_numbers<[1], [0], [0], [1], [0, 0, 1, 1], [], []>} : vector<2x256xbf16>, vector<256x256xbf16>, vector<2x256xf32> -> vector<2x256xf32>
      %c0_47 = arith.constant 0 : index
      %c0_48 = arith.constant 0 : index
      %97 = vector.load %arg12[%c0_47, %c0_48] : memref<1x256xf32, #tpu.memory_space<vmem>>, vector<1x256xf32>
      %98 = vector.broadcast %97 : vector<1x256xf32> to vector<2x256xf32>
      %99 = arith.addf %96, %98 : vector<2x256xf32>
      %cst_49 = arith.constant 0.000000e+00 : f32
      %100 = vector.broadcast %cst_49 : f32 to vector<2x256xf32>
      %101 = arith.maximumf %99, %100 : vector<2x256xf32>
      %102 = arith.truncf %101 : vector<2x256xf32> to vector<2x256xbf16>
      %c0_50 = arith.constant 0 : index
      %c0_51 = arith.constant 0 : index
      %103 = vector.load %arg13[%c0_50, %c0_51] : memref<256x48xbf16, #tpu.memory_space<vmem>>, vector<256x48xbf16>
      %cst_52 = arith.constant dense<0.000000e+00> : vector<2x48xf32>
      %104 = tpu.matmul %102, %103, %cst_52 {dimension_numbers = #tpu.dot_dimension_numbers<[1], [0], [0], [1], [0, 0, 1, 1], [], []>} : vector<2x256xbf16>, vector<256x48xbf16>, vector<2x48xf32> -> vector<2x48xf32>
      %c0_53 = arith.constant 0 : index
      %c0_54 = arith.constant 0 : index
      %105 = vector.load %arg14[%c0_53, %c0_54] : memref<1x48xf32, #tpu.memory_space<vmem>>, vector<1x48xf32>
      %106 = vector.broadcast %105 : vector<1x48xf32> to vector<2x48xf32>
      %107 = arith.addf %104, %106 : vector<2x48xf32>
      %c0_55 = arith.constant 0 : index
      %c0_56 = arith.constant 0 : index
      %108 = vector.load %arg15[%c0_55, %c0_56] : memref<2x48xf32, #tpu.memory_space<vmem>>, vector<2x48xf32>
      tpu.vector_store %arg15[%c0_55, %c0_56], %107 {strides = array<i32>} : memref<2x48xf32, #tpu.memory_space<vmem>>, vector<2x48xf32>,
    } else {
    }
    return
  }
  func.func @transform_0(%arg0: i32, %arg1: i32) -> (i32, i32, i32) {
    %c0_i32 = arith.constant 0 : i32
    %c0_i32_0 = arith.constant 0 : i32
    return %arg0, %c0_i32, %arg1 : i32, i32, i32
  }
  func.func @transform_1(%arg0: i32, %arg1: i32) -> (i32, i32) {
    %c0_i32 = arith.constant 0 : i32
    %c0_i32_0 = arith.constant 0 : i32
    %c0_i32_1 = arith.constant 0 : i32
    return %c0_i32, %c0_i32_0 : i32, i32
  }
  func.func @transform_2(%arg0: i32, %arg1: i32) -> (i32, i32) {
    %c0_i32 = arith.constant 0 : i32
    %c0_i32_0 = arith.constant 0 : i32
    %c0_i32_1 = arith.constant 0 : i32
    return %c0_i32, %c0_i32_0 : i32, i32
  }
  func.func @transform_3(%arg0: i32, %arg1: i32) -> (i32, i32) {
    %c0_i32 = arith.constant 0 : i32
    %c0_i32_0 = arith.constant 0 : i32
    %c0_i32_1 = arith.constant 0 : i32
    return %c0_i32, %c0_i32_0 : i32, i32
  }
  func.func @transform_4(%arg0: i32, %arg1: i32) -> (i32, i32) {
    %c0_i32 = arith.constant 0 : i32
    %c0_i32_0 = arith.constant 0 : i32
    %c0_i32_1 = arith.constant 0 : i32
    return %c0_i32, %c0_i32_0 : i32, i32
  }
  func.func @transform_5(%arg0: i32, %arg1: i32) -> (i32, i32) {
    %c0_i32 = arith.constant 0 : i32
    %c0_i32_0 = arith.constant 0 : i32
    %c0_i32_1 = arith.constant 0 : i32
    return %c0_i32, %c0_i32_0 : i32, i32
  }
  func.func @transform_6(%arg0: i32, %arg1: i32) -> (i32, i32) {
    %c0_i32 = arith.constant 0 : i32
    %c0_i32_0 = arith.constant 0 : i32
    %c0_i32_1 = arith.constant 0 : i32
    return %c0_i32, %c0_i32_0 : i32, i32
  }
  func.func @transform_7(%arg0: i32, %arg1: i32) -> (i32, i32) {
    %c0_i32 = arith.constant 0 : i32
    %c0_i32_0 = arith.constant 0 : i32
    %c0_i32_1 = arith.constant 0 : i32
    return %c0_i32, %c0_i32_0 : i32, i32
  }
  func.func @transform_8(%arg0: i32, %arg1: i32) -> (i32, i32) {
    %c0_i32 = arith.constant 0 : i32
    %c0_i32_0 = arith.constant 0 : i32
    %c0_i32_1 = arith.constant 0 : i32
    return %c0_i32, %c0_i32_0 : i32, i32
  }
  func.func @transform_9(%arg0: i32, %arg1: i32) -> (i32, i32) {
    %c0_i32 = arith.constant 0 : i32
    %c0_i32_0 = arith.constant 0 : i32
    %c0_i32_1 = arith.constant 0 : i32
    return %c0_i32, %c0_i32_0 : i32, i32
  }
  func.func @transform_10(%arg0: i32, %arg1: i32) -> (i32, i32) {
    %c0_i32 = arith.constant 0 : i32
    %c0_i32_0 = arith.constant 0 : i32
    %c0_i32_1 = arith.constant 0 : i32
    return %c0_i32, %c0_i32_0 : i32, i32
  }
  func.func @transform_11(%arg0: i32, %arg1: i32) -> (i32, i32) {
    %c0_i32 = arith.constant 0 : i32
    %c0_i32_0 = arith.constant 0 : i32
    %c0_i32_1 = arith.constant 0 : i32
    return %c0_i32, %c0_i32_0 : i32, i32
  }
  func.func @transform_12(%arg0: i32, %arg1: i32) -> (i32, i32) {
    %c0_i32 = arith.constant 0 : i32
    %c0_i32_0 = arith.constant 0 : i32
    %c0_i32_1 = arith.constant 0 : i32
    return %c0_i32, %c0_i32_0 : i32, i32
  }
  func.func @transform_13(%arg0: i32, %arg1: i32) -> (i32, i32) {
    %c0_i32 = arith.constant 0 : i32
    %c0_i32_0 = arith.constant 0 : i32
    return %arg0, %c0_i32 : i32, i32
  }
}

</mosaic_0001>

<bundles_post_ra>
// kernel: tpu_custom_call.1
= control target key start
LH: loop header
LB: loop body
LE: loop exit
PB: predicated region body
PF: predicated region fallthrough
CT: control target
= control target key end

     0   :  { %v1879_v1 = vmov 2   ;;  %v1880_v2 = vmov 1   ;;  %v1881_v8 = vmov 0   ;;  %s2510_s0 = inlined_call_operand.vmem [shape: f32[2,3,16], index: 0, kind: input, shape index: {}]   ;;  %s2511_s1 = inlined_call_operand.vmem [shape: f32[64,3], index: 1, kind: input, shape index: {}]   ;;  %s2512_s2 = inlined_call_operand.vmem [shape: f32[64,1], index: 2, kind: input, shape index: {}]   ;;  %s2513_s3 = inlined_call_operand.vmem [shape: bf16[128,64], index: 3, kind: input, shape index: {}]   ;;  %s2514_s4 = inlined_call_operand.vmem [shape: f32[128,1], index: 4, kind: input, shape index: {}]   ;;  %s2515_s5 = inlined_call_operand.vmem [shape: bf16[32,128], index: 5, kind: input, shape index: {}]   ;;  %s2516_s6 = inlined_call_operand.vmem [shape: f32[32,1], index: 6, kind: input, shape index: {}]   ;;  %s2517_s7 = inlined_call_operand.vmem [shape: bf16[32,256], index: 7, kind: input, shape index: {}]   ;;  %s2518_s8 = inlined_call_operand.vmem [shape: f32[1,256], index: 8, kind: input, shape index: {}]   ;;  %s2519_s9 = inlined_call_operand.vmem [shape: bf16[256,256], index: 9, kind: input, shape index: {}]   ;;  %s2520_s10 = inlined_call_operand.vmem [shape: f32[1,256], index: 10, kind: input, shape index: {}]   ;;  %s2521_s11 = inlined_call_operand.vmem [shape: bf16[256,48], index: 11, kind: input, shape index: {}]   ;;  %s2522_s12 = inlined_call_operand.vmem [shape: f32[1,48], index: 12, kind: input, shape index: {}]   ;;  %s2523_s13 = inlined_call_operand.hbm [shape: f32[2,48], index: 13, kind: output, shape index: {}]  }
   0x1   :  { %v55_v0 = vld [vmem:[%s2511_s1] sm:$0xff]  ;;  %1761 = vset.pattern.permute.xlu0 %v1879_v1  ;;  %1760 = vset.pattern.permute.xlu1 %v1880_v2  ;;  %v57_v3 = vld [vmem:[%s2511_s1 + $0x10] sm:$0xff]  ;;  %v56_v4 = vld [vmem:[%s2511_s1 + $0x8] sm:$0xff] }
   0x2   :  { %217 = vperm.xlu0 %1761, %v55_v0   ;;  %165 = vperm.xlu1 %1760, %v55_v0   ;;  %v60_v5 = vld [vmem:[%s2511_s1 + $0x28] sm:$0xff]  ;;  %v59_v6 = vld [vmem:[%s2511_s1 + $0x20] sm:$0xff]  ;;  %v62_v7 = vld [vmem:[%s2511_s1 + $0x38] sm:$0xff] }
   0x3   :  { %v58_v9 = vld [vmem:[%s2511_s1 + $0x18] sm:$0xff]  ;;  %v63_v10 = vld [vmem:[%s2512_s2] sm:$0xff]  ;;  %v64_v11 = vld [vmem:[%s2512_s2 + $0x8] sm:$0xff] }
   0x4   :  { %v61_v12 = vld [vmem:[%s2511_s1 + $0x30] sm:$0xff]  ;;  %v67_v13 = vld [vmem:[%s2512_s2 + $0x20] sm:$0xff] }
   0x6   :  { %225 = vperm.xlu0 %1761, %v57_v3   ;;  %169 = vperm.xlu1 %1760, %v56_v4  }
   0xa   :  { %237 = vperm.xlu0 %1761, %v60_v5   ;;  %1762 = vset.pattern.permute.xlu1 %v1879_v1 }
   0xb   :  { %221 = vperm.xlu1 %1762, %v56_v4  }
   0xe   :  { %1769 = vset.pattern.permute.xlu0 %v1880_v2 }
   0xf   :  { %181 = vperm.xlu0 %1769, %v59_v6   ;;  %1763 = vset.pattern.permute.xlu1 %v1881_v8 }
  0x10   :  { %124 = vperm.xlu1 %1763, %v57_v3  }
  0x13   :  { %193 = vperm.xlu0 %1769, %v62_v7  }
  0x14   :  { %1764 = vset.pattern.permute.xlu1 %v1880_v2 }
  0x15   :  { %173 = vperm.xlu1 %1764, %v57_v3  }
  0x17   :  { %1772 = vset.pattern.permute.xlu0 %v1881_v8 }
  0x18   :  { %114 = vperm.xlu0 %1772, %v55_v0  }
  0x19   :  { %177 = vperm.xlu1 %1764, %v58_v9  }
  0x1c   :  { %119 = vperm.xlu0 %1772, %v56_v4  }
  0x1d   :  { %1765 = vset.pattern.permute.xlu1 %v1879_v1 }
  0x1e   :  { %229 = vperm.xlu1 %1765, %v58_v9  }
  0x20   :  { %129 = vperm.xlu0 %1772, %v58_v9  }
  0x22   :  { %1766 = vset.pattern.permute.xlu1 %v1881_v8 }
  0x23   :  { %270 = vperm.xlu1 %1766, %v63_v10  }
  0x24   :  { %275 = vperm.xlu0 %1772, %v64_v11  }
  0x27   :  { %134 = vperm.xlu1 %1766, %v59_v6  }
  0x28   :  { %144 = vperm.xlu0 %1772, %v61_v12  }
  0x29   :  { %18 = vsyncpa [#allocation4], 0  ;;  %v70_v14 = vld [vmem:[%s2512_s2 + $0x38] sm:$0xff]  ;;  %v88_v15 = vld [vmem:[%s2514_s4 + $0x8] sm:$0xff]  ;;  %vm448_vm0 = vcmask 523264   ;;  %v152_v44 = vlaneseq  ;;  %vm675_vm1 = vcmask 130048  }
  0x2a   :  { %v90_v16 = vld [vmem:[%s2514_s4 + $0x18] sm:$0xff]  ;;  %v65_v17 = vld [vmem:[%s2512_s2 + $0x10] sm:$0xff]  ;;  %v92_v18 = vld [vmem:[%s2514_s4 + $0x28] sm:$0xff]  ;;  %vm50_vm2 = vcmask 15360   ;;  %vm696_vm3 = vcmask 7168   ;;  %vm965_vm4 = vcmask 15368  }
  0x2b   :  { %139 = vperm.xlu1 %1766, %v60_v5   ;;  %v66_v19 = vld [vmem:[%s2512_s2 + $0x18] sm:$0xff]  ;;  %v96_v21 = vld [vmem:[%s2514_s4 + $0x48] sm:$0xff]  ;;  %v69_v28 = vld [vmem:[%s2512_s2 + $0x30] sm:$0xff]  ;;  %v153_v47 = vshrl.u32 %v152_v44, 7  ;;  %vm1031_vm5 = vcmask 261120   ;;  %vm1504_vm6 = vcmask 386048  }
  0x2c   :  { %290 = vperm.xlu0 %1772, %v67_v13   ;;  %v94_v20 = vld [vmem:[%s2514_s4 + $0x38] sm:$0xff]  ;;  %v100_v23 = vld [vmem:[%s2514_s4 + $0x68] sm:$0xff]  ;;  %v87_v29 = vld [vmem:[%s2514_s4] sm:$0xff] }
  0x2d   :  { %v98_v22 = vld [vmem:[%s2514_s4 + $0x58] sm:$0xff]  ;;  %v108_v25 = vld [vmem:[%s2516_s6 + $0x8] sm:$0xff]  ;;  %v89_v30 = vld [vmem:[%s2514_s4 + $0x10] sm:$0xff]  ;;  %v2088_v48 = vsub.s32 0, %v153_v47  ;;  %v2092_v50 = vsub.s32 1, %v153_v47  ;;  %v250_v51 = vsub.s32 2, %v153_v47 }
  0x2e   :  { %v102_v24 = vld [vmem:[%s2514_s4 + $0x78] sm:$0xff]  ;;  %v68_v26 = vld [vmem:[%s2512_s2 + $0x28] sm:$0xff]  ;;  %v2056_v31 = vld [vmem:[%s2513_s3] sm:$0xff]  }
  0x2f   :  { %1767 = vset.pattern.permute.xlu1 %v1880_v2  ;;  %v110_v27 = vld [vmem:[%s2516_s6 + $0x18] sm:$0xff]  ;;  %v91_v32 = vld [vmem:[%s2514_s4 + $0x20] sm:$0xff]  ;;  %1675 = vmatprep.mubr.msk.bf16.mxu0 %vm448_vm0, %v2056_v31  ;;  %v93_v33 = vld [vmem:[%s2514_s4 + $0x30] sm:$0xff] }
  0x30   :  { %305 = vperm.xlu0 %1772, %v70_v14   ;;  %185 = vperm.xlu1 %1767, %v60_v5   ;;  %v95_v34 = vld [vmem:[%s2514_s4 + $0x40] sm:$0xff]  ;;  %v97_v35 = vld [vmem:[%s2514_s4 + $0x50] sm:$0xff] }
  0x31   :  { %v99_v36 = vld [vmem:[%s2514_s4 + $0x60] sm:$0xff]  ;;  %v101_v37 = vld [vmem:[%s2514_s4 + $0x70] sm:$0xff] }
  0x32   :  { %v107_v38 = vld [vmem:[%s2516_s6] sm:$0xff]  ;;  %v109_v39 = vld [vmem:[%s2516_s6 + $0x10] sm:$0xff] }
  0x33   :  { %v1538_v53 = vld [vmem:[%s2510_s0 + $0x4] sm:$0x7]  ;;  %v111_v58 = vld [vmem:[%s2510_s0] sm:$0x7] }
  0x34   :  { %335 = vperm.xlu0 %1772, %v88_v15   ;;  %1768 = vset.pattern.permute.xlu1 %v1879_v1  ;;  %v2098_v54 = vrot.slane %v1538_v53, %v2088_v48  ;;  %v2103_v56 = vrot.slane %v1538_v53, %v2092_v50  ;;  %v2105_v57 = vrot.slane %v1538_v53, %v250_v51 }
  0x35   :  { %233 = vperm.xlu1 %1768, %v59_v6   ;;  %v2115_v63 = vrot.slane %v111_v58, %v2092_v50  ;;  %v2118_v0 = vrot.slane %v111_v58, %v2088_v48 }
  0x38   :  { %345 = vperm.xlu0 %1772, %v90_v16  }
  0x39   :  { %1770 = vset.pattern.permute.xlu1 %v1881_v8 }
  0x3a   :  { %280 = vperm.xlu1 %1770, %v65_v17  }
  0x3c   :  { %355 = vperm.xlu0 %1772, %v92_v18  }
  0x3e   :  { %285 = vperm.xlu1 %1770, %v66_v19  }
  0x40   :  { %365 = vperm.xlu0 %1772, %v94_v20  }
  0x42   :  { %149 = vperm.xlu1 %1770, %v62_v7  }
  0x44   :  { %375 = vperm.xlu0 %1772, %v96_v21  }
  0x46   :  { %1771 = vset.pattern.permute.xlu1 %v1880_v2 }
  0x47   :  { %189 = vperm.xlu1 %1771, %v61_v12  }
  0x48   :  { %385 = vperm.xlu0 %1772, %v98_v22  }
  0x4b   :  { %1773 = vset.pattern.permute.xlu1 %v1879_v1 }
  0x4c   :  { %395 = vperm.xlu0 %1772, %v100_v23   ;;  %241 = vperm.xlu1 %1773, %v61_v12   ;;  %v2129_v12 = vrot.slane %v111_v58, %v250_v51 }
  0x50   :  { %405 = vperm.xlu0 %1772, %v102_v24   ;;  %245 = vperm.xlu1 %1773, %v62_v7  }
  0x54   :  { %601 = vperm.xlu0 %1772, %v108_v25   ;;  %1774 = vset.pattern.permute.xlu1 %v1881_v8 }
  0x55   :  { %295 = vperm.xlu1 %1774, %v68_v26  }
  0x58   :  { %611 = vperm.xlu0 %1772, %v110_v27  }
  0x59   :  { %300 = vperm.xlu1 %1774, %v69_v28  }
  0x5d   :  { %330 = vperm.xlu1 %1774, %v87_v29  }
  0x61   :  { %340 = vperm.xlu1 %1774, %v89_v30  }
  0x65   :  { %350 = vperm.xlu1 %1774, %v91_v32  }
  0x69   :  { %360 = vperm.xlu1 %1774, %v93_v33  }
  0x6d   :  { %370 = vperm.xlu1 %1774, %v95_v34  }
  0x71   :  { %380 = vperm.xlu1 %1774, %v97_v35  }
  0x75   :  { %390 = vperm.xlu1 %1774, %v99_v36  }
  0x79   :  { %400 = vperm.xlu1 %1774, %v101_v37  }
  0x7d   :  { %596 = vperm.xlu1 %1774, %v107_v38  }
  0x81   :  { %606 = vperm.xlu1 %1774, %v109_v39   ;;  %v166_v40 = vpop.permute.xlu1 %165  ;;  %v218_v41 = vpop.permute.xlu0 %217 }
  0x82   :  { %v719_v3 = vmul.f32 %v2103_v56, %v166_v40  ;;  %v739_v4 = vmul.f32 %v2105_v57, %v218_v41  ;;  %v200_v11 = vmul.f32 %v2115_v63, %v166_v40  ;;  %v252_v19 = vmul.f32 %v2129_v12, %v218_v41 }
  0x85   :  { %v170_v42 = vpop.permute.xlu1 %169  ;;  %v2084_v43 = vpop.permute.xlu0 %225 }
  0x86   :  { %v741_v60 = vmul.f32 %v2105_v57, %v2084_v43  ;;  %v201_v13 = vmul.f32 %v2115_v63, %v170_v42  ;;  %v720_v15 = vmul.f32 %v2103_v56, %v170_v42 }
  0x89   :  { %v2086_v45 = vpop.permute.xlu0 %237 }
  0x8a   :  { %v222_v46 = vpop.permute.xlu1 %221 }
  0x8b   :  { %v740_v22 = vmul.f32 %v2105_v57, %v222_v46  ;;  %v253_v26 = vmul.f32 %v2129_v12, %v222_v46 }
  0x8e   :  { %v2090_v49 = vpop.permute.xlu0 %181 }
  0x8f   :  { %v125_v52 = vpop.permute.xlu1 %124 }
  0x90   :  { %v709_v61 = vmul.f32 %v2098_v54, %v125_v52  ;;  %v158_v53 = vmul.f32 %v2118_v0, %v125_v52 }
  0x92   :  { %v2100_v55 = vpop.permute.xlu0 %193 }
  0x94   :  { %v174_v59 = vpop.permute.xlu1 %173 }
  0x95   :  { %v721_v62 = vmul.f32 %v2103_v56, %v174_v59  ;;  %v202_v51 = vmul.f32 %v2115_v63, %v174_v59 }
  0x97   :  { %v729_v1 = vadd.f32 %v721_v62, %v709_v61  ;;  %v115_v2 = vpop.permute.xlu0 %114  ;;  %v254_v61 = vmul.f32 %v2129_v12, %v2084_v43  ;;  %v210_v62 = vadd.f32 %v202_v51, %v158_v53 }
  0x98   :  { %v707_v5 = vmul.f32 %v2098_v54, %v115_v2  ;;  %v2123_v6 = vpop.permute.xlu1 %177  ;;  %v156_v7 = vmul.f32 %v2118_v0, %v115_v2 }
  0x99   :  { %v2126_v9 = vadd.f32 %v741_v60, %v729_v1  ;;  %v203_v1 = vmul.f32 %v2115_v63, %v2123_v6  ;;  %v262_v59 = vadd.f32 %v254_v61, %v210_v62  ;;  %v722_v53 = vmul.f32 %v2103_v56, %v2123_v6 }
  0x9a   :  { %v727_v10 = vadd.f32 %v719_v3, %v707_v5  ;;  %v208_v20 = vadd.f32 %v200_v11, %v156_v7 }
  0x9b   :  { %v120_v14 = vpop.permute.xlu0 %119 }
  0x9c   :  { %v157_v16 = vmul.f32 %v2118_v0, %v120_v14  ;;  %v708_v17 = vmul.f32 %v2098_v54, %v120_v14  ;;  %v747_v18 = vadd.f32 %v739_v4, %v727_v10  ;;  %v260_v28 = vadd.f32 %v252_v19, %v208_v20 }
  0x9d   :  { %v2136_v21 = vpop.permute.xlu1 %229 }
  0x9e   :  { %v209_v23 = vadd.f32 %v201_v13, %v157_v16  ;;  %v728_v24 = vadd.f32 %v720_v15, %v708_v17  ;;  %v255_v4 = vmul.f32 %v2129_v12, %v2136_v21  ;;  %v204_v16 = vmul.f32 %v2115_v63, %v2090_v49 }
  0x9f   :  { %v2139_v25 = vpop.permute.xlu0 %129  ;;  %v723_v17 = vmul.f32 %v2103_v56, %v2090_v49 }
  0xa0   :  { %v748_v27 = vadd.f32 %v740_v22, %v728_v24  ;;  %v261_v30 = vadd.f32 %v253_v26, %v209_v23  ;;  %v159_v58 = vmul.f32 %v2118_v0, %v2139_v25 }
  0xa2   :  { %v271_v29 = vpop.permute.xlu1 %270  ;;  %v211_v2 = vadd.f32 %v203_v1, %v159_v58 }
  0xa3   :  { %v308_v32 = vadd.f32 %v271_v29, %v260_v28  ;;  %v755_v33 = vadd.f32 %v747_v18, %v271_v29  ;;  %v276_v34 = vpop.permute.xlu0 %275 }
  0xa4   :  { %v309_v35 = vadd.f32 %v276_v34, %v261_v30  ;;  %v756_v36 = vadd.f32 %v748_v27, %v276_v34  ;;  %v263_v5 = vadd.f32 %v255_v4, %v211_v2 }
  0xa5   :  { %v316_v37 = vmax.f32 %v308_v32, 0.0  ;;  %v763_v38 = vmax.f32 %v755_v33, 0.0 }
  0xa6   :  { %v317_v39 = vmax.f32 %v309_v35, 0.0  ;;  %v764_v40 = vmax.f32 %v756_v36, 0.0  ;;  %v135_v41 = vpop.permute.xlu1 %134  ;;  %v207_v35 = vmul.f32 %v2115_v63, %v2100_v55 }
  0xa7   :  { %v160_v18 = vmul.f32 %v2118_v0, %v135_v41  ;;  %v711_v19 = vmul.f32 %v2098_v54, %v135_v41  ;;  %v145_v20 = vpop.permute.xlu0 %144 }
  0xa8   :  { %v324_v42 = vpack.c.bf16 %v317_v39, %v316_v37  ;;  %v2142_v44 = vpack.c.bf16 %v764_v40, %v763_v38  ;;  %v710_v39 = vmul.f32 %v2098_v54, %v2139_v25  ;;  %v162_v58 = vmul.f32 %v2118_v0, %v145_v20 }
  0xa9   :  { %v212_v28 = vadd.f32 %v204_v16, %v160_v18  ;;  %v731_v29 = vadd.f32 %v723_v17, %v711_v19 }
  0xaa   :  { %1667 = vmatprep.subr.bf16.mxu0 %v324_v42  ;;  %v140_v47 = vpop.permute.xlu1 %139  ;;  %v730_v4 = vadd.f32 %v722_v53, %v710_v39 }
  0xab   :  { %1668 = vmatpush3.bf16.msra.mxu0 %v324_v42  ;;  %v161_v30 = vmul.f32 %v2118_v0, %v140_v47  ;;  %v712_v49 = vmul.f32 %v2098_v54, %v140_v47  ;;  %v291_v40 = vpop.permute.xlu0 %290  ;;  %v257_v42 = vmul.f32 %v2129_v12, %v2086_v45  ;;  %v744_v47 = vmul.f32 %v2105_v57, %v2086_v45 }
  0xaf   :  { %v186_v46 = vpop.permute.xlu1 %185 }
  0xb0   :  { %v205_v24 = vmul.f32 %v2115_v63, %v186_v46  ;;  %v724_v26 = vmul.f32 %v2103_v56, %v186_v46 }
  0xb2   :  { %v213_v36 = vadd.f32 %v205_v24, %v161_v30  ;;  %v732_v37 = vadd.f32 %v724_v26, %v712_v49  ;;  %v713_v30 = vmul.f32 %v2098_v54, %v145_v20 }
  0xb4   :  { %v234_v60 = vpop.permute.xlu1 %233  ;;  %v265_v1 = vadd.f32 %v257_v42, %v213_v36  ;;  %v752_v2 = vadd.f32 %v744_v47, %v732_v37  ;;  %v1778_v36 = vld [vmem:[%s2513_s3 + $0x18] sm:$0xff]   ;;  %v1779_v37 = vld [vmem:[%s2513_s3 + $0x20] sm:$0xff]  }
  0xb5   :  { %v256_v22 = vmul.f32 %v2129_v12, %v234_v60  ;;  %v743_v23 = vmul.f32 %v2105_v57, %v234_v60  ;;  %v2241_v42 = vld [vmem:[%s2515_s5] sm:$0xff]  }
  0xb6   :  { %1707 = vmatprep.mubr.bf16.mxu1 %v2241_v42 }
  0xb7   :  { %v264_v33 = vadd.f32 %v256_v22, %v212_v28  ;;  %v751_v34 = vadd.f32 %v743_v23, %v731_v29  ;;  %v726_v29 = vmul.f32 %v2103_v56, %v2100_v55 }
  0xb9   :  { %v2152_v3 = vpop.permute.xlu1 %280  ;;  %v312_v60 = vadd.f32 %v291_v40, %v264_v33  ;;  %v759_v61 = vadd.f32 %v751_v34, %v291_v40  ;;  %v1781_v40 = vld [vmem:[%s2513_s3 + $0x30] sm:$0xff]  }
  0xba   :  { %v310_v52 = vadd.f32 %v2152_v3, %v262_v59  ;;  %v757_v49 = vadd.f32 %v2126_v9, %v2152_v3 }
  0xbb   :  { %v767_v6 = vmax.f32 %v759_v61, 0.0 }
  0xbc   :  { %v318_v11 = vmax.f32 %v310_v52, 0.0  ;;  %v765_v55 = vmax.f32 %v757_v49, 0.0 }
  0xbd   :  { %v2157_v7 = vpop.permute.xlu1 %285 }
  0xbe   :  { %v311_v10 = vadd.f32 %v2157_v7, %v263_v5 }
  0xc0   :  { %v319_v43 = vmax.f32 %v311_v10, 0.0  ;;  %v306_v10 = vpop.permute.xlu0 %305 }
  0xc1   :  { %v150_v13 = vpop.permute.xlu1 %149 }
  0xc2   :  { %v325_v14 = vpack.c.bf16 %v319_v43, %v318_v11  ;;  %v163_v32 = vmul.f32 %v2118_v0, %v150_v13  ;;  %v320_v11 = vmax.f32 %v312_v60, 0.0  ;;  %v714_v24 = vmul.f32 %v2098_v54, %v150_v13  ;;  %v1777_v54 = vld [vmem:[%s2513_s3 + $0x10] sm:$0xff]  }
  0xc4   :  { %1669 = vmatprep.subr.bf16.mxu0 %v325_v14  ;;  %v215_v46 = vadd.f32 %v207_v35, %v163_v32  ;;  %v734_v34 = vadd.f32 %v726_v29, %v714_v24  ;;  %v1776_v35 = vld [vmem:[%s2513_s3 + $0x8] sm:$0xff]   ;;  %v2246_v47 = vpop.permute.xlu0 %335 }
  0xc5   :  { %1670 = vmatpush3.bf16.msra.mxu0 %v325_v14 }
  0xc6   :  { %v190_v15 = vpop.permute.xlu1 %189 }
  0xc7   :  { %v206_v51 = vmul.f32 %v2115_v63, %v190_v15  ;;  %v742_v63 = vmul.f32 %v2105_v57, %v2136_v21  ;;  %v725_v26 = vmul.f32 %v2103_v56, %v190_v15 }
  0xc9   :  { %v214_v52 = vadd.f32 %v206_v51, %v162_v58  ;;  %v750_v17 = vadd.f32 %v742_v63, %v730_v4  ;;  %v733_v15 = vadd.f32 %v725_v26, %v713_v30  ;;  %v2250_v51 = vpop.permute.xlu0 %345 }
  0xcb   :  { %v242_v27 = vpop.permute.xlu1 %241  ;;  %v758_v23 = vadd.f32 %v750_v17, %v2157_v7 }
  0xcc   :  { %v258_v25 = vmul.f32 %v2129_v12, %v242_v27  ;;  %v745_v32 = vmul.f32 %v2105_v57, %v242_v27 }
  0xcd   :  { %v766_v13 = vmax.f32 %v758_v23, 0.0  ;;  %v2254_v58 = vpop.permute.xlu0 %355 }
  0xce   :  { %v266_v16 = vadd.f32 %v258_v25, %v214_v52  ;;  %v753_v9 = vadd.f32 %v745_v32, %v733_v15 }
  0xcf   :  { %v246_v38 = vpop.permute.xlu1 %245  ;;  %v772_v3 = vpack.c.bf16 %v766_v13, %v765_v55 }
  0xd0   :  { %v259_v41 = vmul.f32 %v2129_v12, %v246_v38  ;;  %v746_v7 = vmul.f32 %v2105_v57, %v246_v38 }
  0xd2   :  { %v267_v62 = vadd.f32 %v259_v41, %v215_v46  ;;  %v754_v56 = vadd.f32 %v746_v7, %v734_v34  ;;  %v1782_v41 = vld [vmem:[%s2513_s3 + $0x38] sm:$0xff]  }
  0xd4   :  { %v296_v59 = vpop.permute.xlu1 %295  ;;  %v315_v43 = vadd.f32 %v306_v10, %v267_v62  ;;  %v762_v20 = vadd.f32 %v754_v56, %v306_v10 }
  0xd5   :  { %v313_v5 = vadd.f32 %v296_v59, %v265_v1  ;;  %v760_v45 = vadd.f32 %v752_v2, %v296_v59  ;;  %v2259_v1 = vpop.permute.xlu0 %365 }
  0xd6   :  { %v323_v21 = vmax.f32 %v315_v43, 0.0  ;;  %v770_v38 = vmax.f32 %v762_v20, 0.0 }
  0xd7   :  { %v321_v0 = vmax.f32 %v313_v5, 0.0  ;;  %v768_v14 = vmax.f32 %v760_v45, 0.0 }
  0xd8   :  { %v301_v12 = vpop.permute.xlu1 %300 }
  0xd9   :  { %v314_v18 = vadd.f32 %v301_v12, %v266_v16  ;;  %v326_v19 = vpack.c.bf16 %v321_v0, %v320_v11  ;;  %v773_v22 = vpack.c.bf16 %v768_v14, %v767_v6  ;;  %v761_v57 = vadd.f32 %v753_v9, %v301_v12  ;;  %v2266_v0 = vpop.permute.xlu0 %375 }
  0xdb   :  { %v322_v28 = vmax.f32 %v314_v18, 0.0  ;;  %1671 = vmatprep.subr.bf16.mxu0 %v326_v19  ;;  %v769_v27 = vmax.f32 %v761_v57, 0.0 }
  0xdc   :  { %1672 = vmatpush3.bf16.msra.mxu0 %v326_v19 }
  0xdd   :  { %v327_v33 = vpack.c.bf16 %v323_v21, %v322_v28  ;;  %v774_v39 = vpack.c.bf16 %v770_v38, %v769_v27  ;;  %v2274_v29 = vpop.permute.xlu0 %385 }
  0xdf   :  { %1673 = vmatprep.subr.bf16.mxu0 %v327_v33 }
  0xe0   :  { %1674 = vmatpush3.bf16.msra.mxu0 %v327_v33 }
  0xe1   :  { %1711 = vmatprep.subr.bf16.mxu0 %v2142_v44  ;;  %v2281_v9 = vpop.permute.xlu0 %395 }
  0xe3   :  { %1676 = vmatmul.mubr.msk.bf16.vlgmr.msra.gmra.mrb[0].mxu0 %vm448_vm0, %v1776_v35 }
  0xe4   :  { %1712 = vmatpush3.bf16.msra.mxu0 %v2142_v44  ;;  %1679 = vmatprep.mubr.msk.bf16.mxu0 %vm448_vm0, %v1777_v54  ;;  %v1780_v44 = vld [vmem:[%s2513_s3 + $0x28] sm:$0xff]  }
  0xe5   :  { %1713 = vmatprep.subr.bf16.mxu0 %v772_v3 }
  0xe8   :  { %1714 = vmatpush3.bf16.msra.mxu0 %v772_v3 }
  0xe9   :  { %1715 = vmatprep.subr.bf16.mxu0 %v773_v22 }
  0xeb   :  { %1680 = vmatmul.mubr.msk.bf16.gmra.mrb[4].mxu0 %vm448_vm0, %v1778_v36 }
  0xec   :  { %1716 = vmatpush3.bf16.msra.mxu0 %v773_v22  ;;  %1683 = vmatprep.mubr.msk.bf16.mxu0 %vm448_vm0, %v1779_v37 }
  0xed   :  { %1717 = vmatprep.subr.bf16.mxu0 %v774_v39 }
  0xf0   :  { %1718 = vmatpush3.bf16.msra.mxu0 %v774_v39 }
  0xf3   :  { %1684 = vmatmul.mubr.msk.bf16.gmra.mrb[8].mxu0 %vm448_vm0, %v1780_v44 }
  0xf4   :  { %1687 = vmatprep.mubr.msk.bf16.mxu0 %vm448_vm0, %v1781_v40 }
  0xfb   :  { %1688 = vmatmul.mubr.msk.bf16.gmra.mrb[12].mxu0 %vm448_vm0, %v1782_v41 }
  0xfc   :  { %1719 = vmatprep.mubr.msk.bf16.mxu0 %vm448_vm0, %v2056_v31  ;;  %v2244_v31 = vpop.permute.xlu1 %330 }
 0x100   :  { %v2248_v46 = vpop.permute.xlu1 %340 }
 0x103   :  { %1720 = vmatmul.mubr.msk.bf16.vlgmr.msra.gmra.mrb[16].mxu0 %vm448_vm0, %v1776_v35 }
 0x104   :  { %1723 = vmatprep.mubr.msk.bf16.mxu0 %vm448_vm0, %v1777_v54  ;;  %v2252_v53 = vpop.permute.xlu1 %350 }
 0x108   :  { %v2256_v60 = vpop.permute.xlu1 %360 }
 0x10b   :  { %1724 = vmatmul.mubr.msk.bf16.gmra.mrb[20].mxu0 %vm448_vm0, %v1778_v36 }
 0x10c   :  { %1727 = vmatprep.mubr.msk.bf16.mxu0 %vm448_vm0, %v1779_v37  ;;  %v2264_v10 = vpop.permute.xlu1 %370 }
 0x110   :  { %v2271_v24 = vpop.permute.xlu1 %380 }
 0x113   :  { %1728 = vmatmul.mubr.msk.bf16.gmra.mrb[24].mxu0 %vm448_vm0, %v1780_v44 }
 0x114   :  { %1731 = vmatprep.mubr.msk.bf16.mxu0 %vm448_vm0, %v1781_v40  ;;  %v2277_v15 = vpop.permute.xlu1 %390 }
 0x118   :  { %v2284_v38 = vpop.permute.xlu1 %400 }
 0x11b   :  { %1732 = vmatmul.mubr.msk.bf16.gmra.mrb[28].mxu0 %vm448_vm0, %v1782_v41 }
 0x1b6   :  { %v1677_v61 = vpop.f32.mrb[0].mxu0 }
 0x1b7   :  { %v516_v25 = vadd.f32 %v1677_v61, %v2248_v46  ;;  %v507_v62 = vpop.f32.mrb[1].mxu0  ;;  %v2287_v61 = vpop.permute.xlu0 %405 }
 0x1b8   :  { %v508_v2 = vadd.f32 %v507_v62, %v2244_v31  ;;  %v1678_v4 = vpop.f32.mrb[2].mxu0 }
 0x1b9   :  { %v519_v59 = vadd.f32 %v1678_v4, %v2250_v51  ;;  %v510_v52 = vpop.f32.mrb[3].mxu0  ;;  %v572_v45 = vmax.f32 %v516_v25, 0.0 }
 0x1ba   :  { %v511_v5 = vadd.f32 %v510_v52, %v2246_v47  ;;  %v570_v11 = vmax.f32 %v508_v2, 0.0 }
 0x1bb   :  { %v573_v63 = vmax.f32 %v519_v59, 0.0 }
 0x1bc   :  { %v571_v6 = vmax.f32 %v511_v5, 0.0 }
 0x1bd   :  { %v587_v43 = vpack.c.bf16 %v573_v63, %v572_v45 }
 0x1be   :  { %v1681_v14 = vpop.f32.mrb[4].mxu0  ;;  %v586_v16 = vpack.c.bf16 %v571_v6, %v570_v11 }
 0x1bf   :  { %v532_v17 = vadd.f32 %v1681_v14, %v2256_v60  ;;  %v523_v12 = vpop.f32.mrb[5].mxu0 }
 0x1c0   :  { %v524_v18 = vadd.f32 %v523_v12, %v2252_v53  ;;  %v1682_v19 = vpop.f32.mrb[6].mxu0  ;;  %1691 = vmatprep.subr.bf16.mxu1 %v586_v16 }
 0x1c1   :  { %v535_v22 = vadd.f32 %v1682_v19, %v2259_v1  ;;  %v526_v23 = vpop.f32.mrb[7].mxu0  ;;  %1692 = vmatpush3.bf16.msra.mxu1 %v586_v16  ;;  %v576_v28 = vmax.f32 %v532_v17, 0.0 }
 0x1c2   :  { %v527_v26 = vadd.f32 %v526_v23, %v2254_v58  ;;  %1693 = vmatprep.subr.bf16.mxu1 %v587_v43  ;;  %v574_v30 = vmax.f32 %v524_v18, 0.0 }
 0x1c3   :  { %v577_v21 = vmax.f32 %v535_v22, 0.0 }
 0x1c4   :  { %v575_v49 = vmax.f32 %v527_v26, 0.0 }
 0x1c5   :  { %v589_v32 = vpack.c.bf16 %v577_v21, %v576_v28  ;;  %1694 = vmatpush3.bf16.msra.mxu1 %v587_v43 }
 0x1c6   :  { %v588_v7 = vpack.c.bf16 %v575_v49, %v574_v30  ;;  %v1685_v33 = vpop.f32.mrb[8].mxu0 }
 0x1c7   :  { %v548_v13 = vadd.f32 %v1685_v33, %v2271_v24  ;;  %v539_v34 = vpop.f32.mrb[9].mxu0 }
 0x1c8   :  { %v540_v35 = vadd.f32 %v539_v34, %v2264_v10  ;;  %v1686_v54 = vpop.f32.mrb[10].mxu0  ;;  %1695 = vmatprep.subr.bf16.mxu1 %v588_v7 }
 0x1c9   :  { %v551_v55 = vadd.f32 %v1686_v54, %v2274_v29  ;;  %v542_v56 = vpop.f32.mrb[11].mxu0  ;;  %1696 = vmatpush3.bf16.msra.mxu1 %v588_v7  ;;  %v580_v3 = vmax.f32 %v548_v13, 0.0 }
 0x1ca   :  { %v543_v57 = vadd.f32 %v542_v56, %v2266_v0  ;;  %1697 = vmatprep.subr.bf16.mxu1 %v589_v32  ;;  %v578_v27 = vmax.f32 %v540_v35, 0.0 }
 0x1cb   :  { %v581_v20 = vmax.f32 %v551_v55, 0.0 }
 0x1cc   :  { %v579_v36 = vmax.f32 %v543_v57, 0.0 }
 0x1cd   :  { %v591_v37 = vpack.c.bf16 %v581_v20, %v580_v3  ;;  %1698 = vmatpush3.bf16.msra.mxu1 %v589_v32 }
 0x1ce   :  { %v590_v39 = vpack.c.bf16 %v579_v36, %v578_v27  ;;  %v1689_v44 = vpop.f32.mrb[12].mxu0 }
 0x1cf   :  { %v564_v40 = vadd.f32 %v1689_v44, %v2284_v38  ;;  %v555_v41 = vpop.f32.mrb[13].mxu0 }
 0x1d0   :  { %v556_v25 = vadd.f32 %v555_v41, %v2277_v15  ;;  %v1690_v62 = vpop.f32.mrb[14].mxu0  ;;  %1699 = vmatprep.subr.bf16.mxu1 %v590_v39 }
 0x1d1   :  { %v567_v2 = vadd.f32 %v1690_v62, %v2287_v61  ;;  %v558_v4 = vpop.f32.mrb[15].mxu0  ;;  %1700 = vmatpush3.bf16.msra.mxu1 %v590_v39  ;;  %v584_v52 = vmax.f32 %v564_v40, 0.0 }
 0x1d2   :  { %v559_v59 = vadd.f32 %v558_v4, %v2281_v9  ;;  %1701 = vmatprep.subr.bf16.mxu1 %v591_v37  ;;  %v582_v45 = vmax.f32 %v556_v25, 0.0 }
 0x1d3   :  { %v585_v5 = vmax.f32 %v567_v2, 0.0 }
 0x1d4   :  { %v583_v63 = vmax.f32 %v559_v59, 0.0 }
 0x1d5   :  { %v593_v11 = vpack.c.bf16 %v585_v5, %v584_v52  ;;  %1702 = vmatpush3.bf16.msra.mxu1 %v591_v37 }
 0x1d6   :  { %v592_v6 = vpack.c.bf16 %v583_v63, %v582_v45  ;;  %v1721_v43 = vpop.f32.mrb[16].mxu0 }
 0x1d7   :  { %v818_v14 = vadd.f32 %v1721_v43, %v2248_v46  ;;  %v809_v16 = vpop.f32.mrb[17].mxu0  ;;  %v2299_v46 = vld [vmem:[%s2515_s5 + $0x8] sm:$0xff]  }
 0x1d8   :  { %v810_v17 = vadd.f32 %v809_v16, %v2244_v31  ;;  %1703 = vmatprep.subr.bf16.mxu1 %v592_v6  ;;  %v1722_v12 = vpop.f32.mrb[18].mxu0 }
 0x1d9   :  { %v821_v18 = vadd.f32 %v1722_v12, %v2250_v51  ;;  %1704 = vmatpush3.bf16.msra.mxu1 %v592_v6  ;;  %v812_v19 = vpop.f32.mrb[19].mxu0  ;;  %v874_v23 = vmax.f32 %v818_v14, 0.0 }
 0x1da   :  { %v813_v22 = vadd.f32 %v812_v19, %v2246_v47  ;;  %1705 = vmatprep.subr.bf16.mxu1 %v593_v11  ;;  %v872_v28 = vmax.f32 %v810_v17, 0.0 }
 0x1db   :  { %v875_v26 = vmax.f32 %v821_v18, 0.0 }
 0x1dc   :  { %v873_v21 = vmax.f32 %v813_v22, 0.0 }
 0x1dd   :  { %v889_v30 = vpack.c.bf16 %v875_v26, %v874_v23  ;;  %1706 = vmatpush3.bf16.msra.mxu1 %v593_v11 }
 0x1de   :  { %v888_v31 = vpack.c.bf16 %v873_v21, %v872_v28  ;;  %v1725_v49 = vpop.f32.mrb[20].mxu0  ;;  %v1882_v21 = vmov -inf  }
 0x1df   :  { %v834_v51 = vadd.f32 %v1725_v49, %v2256_v60  ;;  %v825_v32 = vpop.f32.mrb[21].mxu0  ;;  %51 = vst.msk [vmem:[#allocation2] sm:$0xff] %vm50_vm2, %v1882_v21  ;;  %52 = vst.msk [vmem:[#allocation2 + $0x8] sm:$0xff] %vm50_vm2, %v1882_v21 }
 0x1e0   :  { %v826_v7 = vadd.f32 %v825_v32, %v2252_v53  ;;  %1708 = vmatmul.mubr.bf16.vlgmr.msra.gmra.mrb[0].mxu1 %v2299_v46  ;;  %v1726_v47 = vpop.f32.mrb[22].mxu0  ;;  %1735 = vmatprep.subr.bf16.mxu1 %v888_v31  ;;  %53 = vst.msk [vmem:[#allocation2 + $0x10] sm:$0xff] %vm50_vm2, %v1882_v21  ;;  %54 = vst.msk [vmem:[#allocation2 + $0x18] sm:$0xff] %vm50_vm2, %v1882_v21  ;;  %v1812_v21 = vld [vmem:[%s2519_s9 + $0x70] ss:$8 sps:$4 sm:$0xff]  }
 0x1e1   :  { %v837_v33 = vadd.f32 %v1726_v47, %v2259_v1  ;;  %v828_v13 = vpop.f32.mrb[23].mxu0  ;;  %1736 = vmatpush3.bf16.msra.mxu1 %v888_v31  ;;  %1751 = vmatprep.mubr.bf16.mxu1 %v2241_v42  ;;  %v878_v35 = vmax.f32 %v834_v51, 0.0 }
 0x1e2   :  { %v829_v34 = vadd.f32 %v828_v13, %v2254_v58  ;;  %1737 = vmatprep.subr.bf16.mxu1 %v889_v30  ;;  %v876_v55 = vmax.f32 %v826_v7, 0.0 }
 0x1e3   :  { %v879_v54 = vmax.f32 %v837_v33, 0.0 }
 0x1e4   :  { %v877_v60 = vmax.f32 %v829_v34, 0.0 }
 0x1e5   :  { %v891_v56 = vpack.c.bf16 %v879_v54, %v878_v35  ;;  %1738 = vmatpush3.bf16.msra.mxu1 %v889_v30  ;;  %v1785_v54 = vld [vmem:[%s2517_s7] ss:$8 sps:$4 sm:$0xff]  }
 0x1e6   :  { %v890_v53 = vpack.c.bf16 %v877_v60, %v876_v55  ;;  %v1729_v57 = vpop.f32.mrb[24].mxu0  ;;  %v1787_v55 = vld [vmem:[%s2517_s7 + $0x4] ss:$8 sps:$4 sm:$0xff]   ;;  %v1790_v60 = vld [vmem:[%s2517_s7 + $0x14] ss:$8 sps:$4 sm:$0xff]  }
 0x1e7   :  { %v850_v3 = vadd.f32 %v1729_v57, %v2271_v24  ;;  %v841_v20 = vpop.f32.mrb[25].mxu0 }
 0x1e8   :  { %v842_v1 = vadd.f32 %v841_v20, %v2264_v10  ;;  %v1730_v27 = vpop.f32.mrb[26].mxu0  ;;  %1739 = vmatprep.subr.bf16.mxu1 %v890_v53 }
 0x1e9   :  { %v853_v42 = vadd.f32 %v1730_v27, %v2274_v29  ;;  %v844_v36 = vpop.f32.mrb[27].mxu0  ;;  %1740 = vmatpush3.bf16.msra.mxu1 %v890_v53  ;;  %v882_v37 = vmax.f32 %v850_v3, 0.0  ;;  %v688_v53 = vld [vmem:[#allocation2] sm:$0xff]  ;;  %v689_v3 = vld [vmem:[#allocation2 + $0x8] sm:$0xff]  ;;  %v691_v27 = vld [vmem:[#allocation2 + $0x18] sm:$0xff] }
 0x1ea   :  { %v845_v58 = vadd.f32 %v844_v36, %v2266_v0  ;;  %1741 = vmatprep.subr.bf16.mxu1 %v891_v56  ;;  %v880_v44 = vmax.f32 %v842_v1, 0.0 }
 0x1eb   :  { %v883_v39 = vmax.f32 %v853_v42, 0.0 }
 0x1ec   :  { %v881_v40 = vmax.f32 %v845_v58, 0.0  ;;  %v690_v58 = vld [vmem:[#allocation2 + $0x10] sm:$0xff] }
 0x1ed   :  { %v893_v41 = vpack.c.bf16 %v883_v39, %v882_v37  ;;  %1742 = vmatpush3.bf16.msra.mxu1 %v891_v56  ;;  %v1788_v56 = vld [vmem:[%s2517_s7 + $0x10] ss:$8 sps:$4 sm:$0xff]  }
 0x1ee   :  { %v892_v25 = vpack.c.bf16 %v881_v40, %v880_v44  ;;  %v1733_v24 = vpop.f32.mrb[28].mxu0  ;;  %v1791_v40 = vld [vmem:[%s2519_s9] ss:$8 sps:$4 sm:$0xff]  }
 0x1ef   :  { %v866_v62 = vadd.f32 %v1733_v24, %v2284_v38  ;;  %v857_v10 = vpop.f32.mrb[29].mxu0  ;;  %v597_v38 = vpop.permute.xlu1 %596  ;;  %v1794_v24 = vld [vmem:[%s2519_s9 + $0x10] ss:$8 sps:$4 sm:$0xff]  }
 0x1f0   :  { %v858_v2 = vadd.f32 %v857_v10, %v2277_v15  ;;  %v1734_v4 = vpop.f32.mrb[30].mxu0  ;;  %1743 = vmatprep.subr.bf16.mxu1 %v892_v25  ;;  %v602_v15 = vpop.permute.xlu0 %601  ;;  %v1797_v10 = vld [vmem:[%s2519_s9 + $0x20] ss:$8 sps:$4 sm:$0xff]  }
 0x1f1   :  { %v869_v29 = vadd.f32 %v1734_v4, %v2287_v61  ;;  %v860_v59 = vpop.f32.mrb[31].mxu0  ;;  %1744 = vmatpush3.bf16.msra.mxu1 %v892_v25  ;;  %v886_v52 = vmax.f32 %v866_v62, 0.0  ;;  %v1796_v25 = vld [vmem:[%s2519_s9 + $0x14] ss:$8 sps:$4 sm:$0xff]   ;;  %v1799_v62 = vld [vmem:[%s2519_s9 + $0x24] ss:$8 sps:$4 sm:$0xff]  }
 0x1f2   :  { %v861_v0 = vadd.f32 %v860_v59, %v2281_v9  ;;  %1745 = vmatprep.subr.bf16.mxu1 %v893_v41  ;;  %v884_v45 = vmax.f32 %v858_v2, 0.0  ;;  %v1802_v2 = vld [vmem:[%s2519_s9 + $0x34] ss:$8 sps:$4 sm:$0xff]  }
 0x1f3   :  { %v887_v5 = vmax.f32 %v869_v29, 0.0  ;;  %v607_v22 = vpop.permute.xlu1 %606 }
 0x1f4   :  { %v885_v63 = vmax.f32 %v861_v0, 0.0  ;;  %v612_v16 = vpop.permute.xlu0 %611  ;;  %v1800_v0 = vld [vmem:[%s2519_s9 + $0x30] ss:$8 sps:$4 sm:$0xff]  }
 0x1f5   :  { %v895_v11 = vpack.c.bf16 %v887_v5, %v886_v52  ;;  %1746 = vmatpush3.bf16.msra.mxu1 %v893_v41  ;;  %v1793_v41 = vld [vmem:[%s2519_s9 + $0x4] ss:$8 sps:$4 sm:$0xff]  }
 0x1f6   :  { %v894_v6 = vpack.c.bf16 %v885_v63, %v884_v45  ;;  %1284 = vmatprep.subr.bf16.mxu0 %v1793_v41  ;;  %v1805_v45 = vld [vmem:[%s2519_s9 + $0x44] ss:$8 sps:$4 sm:$0xff]   ;;  %v983_v41 = vld [vmem:[%s2518_s8] sm:$0x3] }
 0x1f7   :  { %1285 = vmatpush1.bf16.msra.mxu0 %v1791_v40  ;;  %v1850_v40 = vld [vmem:[%s2521_s11 + $0x28] sm:$0xff]  }
 0x1f8   :  { %1747 = vmatprep.subr.bf16.mxu1 %v894_v6  ;;  %1286 = vmatprep.subr.bf16.mxu0 %v1796_v25  ;;  %v988_v25 = vrot.slane %v983_v41, %v2088_v48 }
 0x1f9   :  { %1748 = vmatpush3.bf16.msra.mxu1 %v894_v6 }
 0x1fa   :  { %1749 = vmatprep.subr.bf16.mxu1 %v895_v11 }
 0x1fb   :  { %1287 = vmatpush1.bf16.msra.mxu0 %v1794_v24  ;;  %v992_v24 = vrot.slane %v983_v41, %v2092_v50 }
 0x1fc   :  { %1288 = vmatprep.subr.bf16.mxu0 %v1799_v62 }
 0x1fd   :  { %1750 = vmatpush3.bf16.msra.mxu1 %v895_v11 }
 0x1fe   :  { %1035 = vmatprep.subr.bf16.mxu1 %v1787_v55  ;;  %v1835_v55 = vld [vmem:[%s2519_s9 + $0xe4] ss:$8 sps:$4 sm:$0xff]  }
 0x1ff   :  { %1289 = vmatpush1.bf16.msra.mxu0 %v1797_v10 }
 0x200   :  { %1752 = vmatmul.mubr.bf16.vlgmr.msra.gmra.mrb[4].mxu1 %v2299_v46  ;;  %1290 = vmatprep.subr.bf16.mxu0 %v1802_v2 }
 0x201   :  { %1067 = vmatprep.mubr.bf16.mxu1 %v1881_v8  ;;  %1036 = vmatpush1.bf16.msra.mxu1 %v1785_v54 }
 0x202   :  { %1037 = vmatprep.subr.bf16.mxu1 %v1790_v60  ;;  %v1833_v60 = vld [vmem:[%s2519_s9 + $0xe0] ss:$8 sps:$4 sm:$0xff]  }
 0x203   :  { %1291 = vmatpush1.bf16.msra.mxu0 %v1800_v0 }
 0x204   :  { %1292 = vmatprep.subr.bf16.mxu0 %v1805_v45 }
 0x205   :  { %1038 = vmatpush1.bf16.msra.mxu1 %v1788_v56  ;;  %v1838_v56 = vld [vmem:[%s2519_s9 + $0xf4] ss:$8 sps:$4 sm:$0xff]  }
 0x2b3   :  { %v1709_v61 = vpop.f32.mrb[0].mxu1 }
 0x2b4   :  { %v660_v9 = vpop.f32.mrb[1].mxu1  ;;  %v669_v23 = vadd.f32 %v1709_v61, %v607_v22 }
 0x2b5   :  { %v661_v43 = vadd.f32 %v660_v9, %v597_v38  ;;  %v1710_v14 = vpop.f32.mrb[2].mxu1 }
 0x2b6   :  { %v663_v17 = vpop.f32.mrb[3].mxu1  ;;  %v672_v12 = vadd.f32 %v1710_v14, %v612_v16  ;;  %v682_v28 = vsel %vm675_vm1, %v669_v23, -inf  ;;  %v1814_v23 = vld [vmem:[%s2519_s9 + $0x74] ss:$8 sps:$4 sm:$0xff]  }
 0x2b7   :  { %v664_v18 = vadd.f32 %v663_v17, %v602_v15  ;;  %v676_v19 = vsel %vm675_vm1, %v661_v43, -inf  ;;  %v1808_v43 = vld [vmem:[%s2519_s9 + $0x54] ss:$8 sps:$4 sm:$0xff]   ;;  %v1811_v17 = vld [vmem:[%s2519_s9 + $0x64] ss:$8 sps:$4 sm:$0xff]  }
 0x2b8   :  { %677 = vmax.xlane.f32.xlu1 %v676_v19  ;;  %v685_v8 = vsel %vm675_vm1, %v672_v12, -inf }
 0x2b9   :  { %v679_v26 = vsel %vm675_vm1, %v664_v18, -inf }
 0x2ba   :  { %680 = vmax.xlane.f32.xlu0 %v679_v26 }
 0x2bc   :  { %686 = vmax.xlane.f32.xlu1 %v685_v8 }
 0x2be   :  { %683 = vmax.xlane.f32.xlu0 %v682_v28 }
 0x2d3   :  { %v1753_v46 = vpop.f32.mrb[4].mxu1 }
 0x2d4   :  { %v930_v30 = vpop.f32.mrb[5].mxu1  ;;  %v939_v32 = vadd.f32 %v1753_v46, %v607_v22  ;;  %v1809_v22 = vld [vmem:[%s2519_s9 + $0x60] ss:$8 sps:$4 sm:$0xff]   ;;  %v1817_v46 = vld [vmem:[%s2519_s9 + $0x84] ss:$8 sps:$4 sm:$0xff]  }
 0x2d5   :  { %v931_v31 = vadd.f32 %v930_v30, %v597_v38  ;;  %v1754_v49 = vpop.f32.mrb[6].mxu1  ;;  %v1803_v38 = vld [vmem:[%s2519_s9 + $0x40] ss:$8 sps:$4 sm:$0xff]  }
 0x2d6   :  { %v933_v51 = vpop.f32.mrb[7].mxu1  ;;  %v942_v33 = vadd.f32 %v1754_v49, %v612_v16  ;;  %v951_v34 = vsel %vm675_vm1, %v939_v32, -inf  ;;  %1293 = vmatpush1.bf16.msra.mxu0 %v1803_v38  ;;  %v1806_v16 = vld [vmem:[%s2519_s9 + $0x50] ss:$8 sps:$4 sm:$0xff]   ;;  %v1815_v30 = vld [vmem:[%s2519_s9 + $0x80] ss:$8 sps:$4 sm:$0xff]  }
 0x2d7   :  { %v934_v7 = vadd.f32 %v933_v51, %v602_v15  ;;  %v945_v47 = vsel %vm675_vm1, %v931_v31, -inf  ;;  %1294 = vmatprep.subr.bf16.mxu0 %v1808_v43  ;;  %v1820_v31 = vld [vmem:[%s2519_s9 + $0x94] ss:$8 sps:$4 sm:$0xff]   ;;  %v1818_v49 = vld [vmem:[%s2519_s9 + $0x90] ss:$8 sps:$4 sm:$0xff]  }
 0x2d8   :  { %946 = vmax.xlane.f32.xlu0 %v945_v47  ;;  %v954_v35 = vsel %vm675_vm1, %v942_v33, -inf  ;;  %v1823_v51 = vld [vmem:[%s2519_s9 + $0xa4] ss:$8 sps:$4 sm:$0xff]   ;;  %v1821_v32 = vld [vmem:[%s2519_s9 + $0xa0] ss:$8 sps:$4 sm:$0xff]  }
 0x2d9   :  { %v948_v13 = vsel %vm675_vm1, %v934_v7, -inf  ;;  %v1826_v7 = vld [vmem:[%s2519_s9 + $0xb4] ss:$8 sps:$4 sm:$0xff]   ;;  %v1824_v47 = vld [vmem:[%s2519_s9 + $0xb0] ss:$8 sps:$4 sm:$0xff]  }
 0x2da   :  { %949 = vmax.xlane.f32.xlu1 %v948_v13  ;;  %1295 = vmatpush1.bf16.msra.mxu0 %v1806_v16  ;;  %v1829_v33 = vld [vmem:[%s2519_s9 + $0xc4] ss:$8 sps:$4 sm:$0xff]   ;;  %v1827_v13 = vld [vmem:[%s2519_s9 + $0xc0] ss:$8 sps:$4 sm:$0xff]  }
 0x2db   :  { %1296 = vmatprep.subr.bf16.mxu0 %v1811_v17  ;;  %v1112_v38 = vld [vmem:[%s2520_s10] sm:$0x3]  ;;  %s1883_s10 = smov [#allocation3]  }
 0x2dc   :  { %952 = vmax.xlane.f32.xlu0 %v951_v34  ;;  %v1832_v34 = vld [vmem:[%s2519_s9 + $0xd4] ss:$8 sps:$4 sm:$0xff]   ;;  %s1512_s0 = sshll.u32 %s1883_s10, 4  ;;  %s1513_s0 = int_to_ptr.vmem [resolvable:$true] %s1512_s0 }
 0x2dd   :  { %s1855_s29 = scalar_lea.vmem %s1513_s0, 32  ;;  %p1860_p1 = scmp.lt.s32.totalorder %s1513_s0, %s1513_s0 }
 0x2de   :  { %955 = vmax.xlane.f32.xlu1 %v954_v35  ;;  %1297 = vmatpush1.bf16.msra.mxu0 %v1809_v22  ;;  %v1830_v35 = vld [vmem:[%s2519_s9 + $0xd0] ss:$8 sps:$4 sm:$0xff]   ;;  %p1856_p0 = scmp.ne.s32.totalorder %s1513_s0, %s1855_s29  ;;  %p1861_p2 = scmp.lt.s32.totalorder %s1855_s29, %s1855_s29 }
 0x2df   :  { %1298 = vmatprep.subr.bf16.mxu0 %v1814_v23 }
 0x2e0   :  { %p1862_p3 = por %p1861_p2, %p1860_p1 }
 0x2e2   :  { %1299 = vmatpush1.bf16.msra.mxu0 %v1812_v21  ;;  %p1863_p4 = pnand %p1862_p3, %p1856_p0 }
 0x2e3   :  { %1300 = vmatprep.subr.bf16.mxu0 %v1817_v46 }
 0x2e6   :  { %1301 = vmatpush1.bf16.msra.mxu0 %v1815_v30 }
 0x2e7   :  { %1302 = vmatprep.subr.bf16.mxu0 %v1820_v31 }
 0x2ea   :  { %1303 = vmatpush1.bf16.msra.mxu0 %v1818_v49 }
 0x2eb   :  { %1304 = vmatprep.subr.bf16.mxu0 %v1823_v51 }
 0x2ee   :  { %1305 = vmatpush1.bf16.msra.mxu0 %v1821_v32 }
 0x2ef   :  { %1306 = vmatprep.subr.bf16.mxu0 %v1826_v7 }
 0x2f2   :  { %1307 = vmatpush1.bf16.msra.mxu0 %v1824_v47 }
 0x2f3   :  { %1308 = vmatprep.subr.bf16.mxu0 %v1829_v33 }
 0x2f6   :  { %1309 = vmatpush1.bf16.msra.mxu0 %v1827_v13 }
 0x2f7   :  { %1310 = vmatprep.subr.bf16.mxu0 %v1832_v34 }
 0x2fa   :  { %1311 = vmatpush1.bf16.msra.mxu0 %v1830_v35 }
 0x2fb   :  { %1312 = vmatprep.subr.bf16.mxu0 %v1835_v55 }
 0x2fe   :  { %1313 = vmatpush1.bf16.msra.mxu0 %v1833_v60 }
 0x2ff   :  { %1314 = vmatprep.subr.bf16.mxu0 %v1838_v56 }
 0x345   :  { %v678_v57 = vpop.xlane.xlu1 %677 }
 0x346   :  { %v692_v20 = vmax.f32 %v688_v53, %v678_v57  ;;  %v1836_v53 = vld [vmem:[%s2519_s9 + $0xf0] ss:$8 sps:$4 sm:$0xff]   ;;  %v1839_v57 = vld [vmem:[%s2521_s11 + $0x40] sm:$0xff]  }
 0x347   :  { %v681_v1 = vpop.xlane.xlu0 %680  ;;  %1315 = vmatpush1.bf16.msra.mxu0 %v1836_v53  ;;  %1645 = vmatprep.subr.bf16.mxu1 %v1839_v57 }
 0x348   :  { %697 = vst.msk [vmem:[#allocation2] sm:$0xff] %vm696_vm3, %v692_v20  ;;  %v693_v42 = vmax.f32 %v689_v3, %v681_v1  ;;  %v1840_v3 = vld [vmem:[%s2521_s11] sm:$0xff]   ;;  %v1841_v20 = vld [vmem:[%s2521_s11 + $0x48] sm:$0xff]  }
 0x349   :  { %v687_v36 = vpop.xlane.xlu1 %686  ;;  %v1842_v1 = vld [vmem:[%s2521_s11 + $0x8] sm:$0xff]  }
 0x34a   :  { %698 = vst.msk [vmem:[#allocation2 + $0x8] sm:$0xff] %vm696_vm3, %v693_v42  ;;  %v695_v37 = vmax.f32 %v691_v27, %v687_v36  ;;  %v1843_v27 = vld [vmem:[%s2521_s11 + $0x50] sm:$0xff]   ;;  %v1845_v36 = vld [vmem:[%s2521_s11 + $0x58] sm:$0xff]  }
 0x34b   :  { %v684_v39 = vpop.xlane.xlu0 %683  ;;  %v1844_v42 = vld [vmem:[%s2521_s11 + $0x10] sm:$0xff]  }
 0x34c   :  { %700 = vst.msk [vmem:[#allocation2 + $0x18] sm:$0xff] %vm696_vm3, %v695_v37  ;;  %v694_v44 = vmax.f32 %v690_v58, %v684_v39  ;;  %v1846_v58 = vld [vmem:[%s2521_s11 + $0x18] sm:$0xff]   ;;  %v1847_v37 = vld [vmem:[%s2521_s11 + $0x60] sm:$0xff]  }
 0x34d   :  { %v1848_v39 = vld [vmem:[%s2521_s11 + $0x20] sm:$0xff]  }
 0x34e   :  { %699 = vst.msk [vmem:[#allocation2 + $0x10] sm:$0xff] %vm696_vm3, %v694_v44  ;;  %v1849_v44 = vld [vmem:[%s2521_s11 + $0x68] sm:$0xff]  }
 0x34f   :  { %v957_v29 = vld [vmem:[#allocation2] sm:$0xff] }
 0x351   :  { %v958_v5 = vld [vmem:[#allocation2 + $0x8] sm:$0xff] }
 0x353   :  { %v960_v9 = vld [vmem:[#allocation2 + $0x18] sm:$0xff] }
 0x355   :  { %v959_v6 = vld [vmem:[#allocation2 + $0x10] sm:$0xff] }
 0x365   :  { %v947_v4 = vpop.xlane.xlu0 %946 }
 0x366   :  { %v961_v59 = vmax.f32 %v957_v29, %v947_v4 }
 0x367   :  { %v950_v52 = vpop.xlane.xlu1 %949 }
 0x368   :  { %966 = vst.msk [vmem:[#allocation2] sm:$0xff] %vm965_vm4, %v961_v59  ;;  %v962_v63 = vmax.f32 %v958_v5, %v950_v52 }
 0x369   :  { %v953_v11 = vpop.xlane.xlu0 %952 }
 0x36a   :  { %967 = vst.msk [vmem:[#allocation2 + $0x8] sm:$0xff] %vm965_vm4, %v962_v63  ;;  %v963_v15 = vmax.f32 %v959_v6, %v953_v11  ;;  %v1851_v63 = vld [vmem:[%s2521_s11 + $0x70] sm:$0xff]   ;;  %v1853_v6 = vld [vmem:[%s2521_s11 + $0x78] sm:$0xff]  }
 0x36b   :  { %v956_v61 = vpop.xlane.xlu1 %955  ;;  %v1852_v11 = vld [vmem:[%s2521_s11 + $0x30] sm:$0xff]  }
 0x36c   :  { %968 = vst.msk [vmem:[#allocation2 + $0x10] sm:$0xff] %vm965_vm4, %v963_v15  ;;  %v964_v14 = vmax.f32 %v960_v9, %v956_v61  ;;  %v1854_v15 = vld [vmem:[%s2521_s11 + $0x38] sm:$0xff]   ;;  %v1117_v61 = vrot.slane %v1112_v38, %v2088_v48  ;;  %v1121_v9 = vrot.slane %v1112_v38, %v2092_v50 }
 0x36e   :  { %969 = vst.msk [vmem:[#allocation2 + $0x18] sm:$0xff] %vm965_vm4, %v964_v14 }
 0x36f   :  { %v973_v12 = vld [vmem:[#allocation2] sm:$0xff] }
 0x371   :  { %v974_v18 = vld [vmem:[#allocation2 + $0x8] sm:$0xff] }
 0x372   :  { %v977_v19 = vpack.c.bf16 %v974_v18, %v973_v12 }
 0x373   :  { %v975_v26 = vld [vmem:[#allocation2 + $0x10] sm:$0xff] }
 0x374   :  { %995 = vxpose.xlu0.c.b16.start [1/2] (short) (narrow) %v977_v19, 16 }
 0x375   :  { %v976_v8 = vld [vmem:[#allocation2 + $0x18] sm:$0xff] }
 0x376   :  { %v978_v28 = vpack.c.bf16 %v976_v8, %v975_v26 }
 0x378   :  { %996 = vxpose.xlu0.c.b16.end [2/2] (short) (narrow) %v978_v28, 16  ;;  %v1584_v28 = vld [vmem:[%s2522_s12] ss:$0 sm:$0xff] }
 0x3da   :  { %v1003_v54 = vpop.trf.xlu0 }
 0x3db   :  { %1551 = vmatmul.mubr.msk.bf16.vlgmr.msra.gmra.mrb[8].mxu1 %vm1031_vm5, %v1003_v54 }
 0x3dc   :  { %1646 = vmatpush3.bf16.msra.mxu1 %v1840_v3 }
 0x3dd   :  { %1647 = vmatprep.subr.bf16.mxu1 %v1841_v20 }
 0x3e0   :  { %1648 = vmatpush3.bf16.msra.mxu1 %v1842_v1 }
 0x3e1   :  { %1649 = vmatprep.subr.bf16.mxu1 %v1843_v27 }
 0x3e4   :  { %1650 = vmatpush3.bf16.msra.mxu1 %v1844_v42 }
 0x3e5   :  { %1651 = vmatprep.subr.bf16.mxu1 %v1845_v36 }
 0x3e8   :  { %1652 = vmatpush3.bf16.msra.mxu1 %v1846_v58 }
 0x3e9   :  { %1653 = vmatprep.subr.bf16.mxu1 %v1847_v37 }
 0x3ec   :  { %1654 = vmatpush3.bf16.msra.mxu1 %v1848_v39 }
 0x3ed   :  { %1655 = vmatprep.subr.bf16.mxu1 %v1849_v44 }
 0x3f0   :  { %1656 = vmatpush3.bf16.msra.mxu1 %v1850_v40 }
 0x3f1   :  { %1657 = vmatprep.subr.bf16.mxu1 %v1851_v63 }
 0x3f4   :  { %1658 = vmatpush3.bf16.msra.mxu1 %v1852_v11 }
 0x3f5   :  { %1659 = vmatprep.subr.bf16.mxu1 %v1853_v6 }
 0x3f8   :  { %1660 = vmatpush3.bf16.msra.mxu1 %v1854_v15 }
 0x4ae   :  { %v1069_v62 = vpop.f32.mrb[8].mxu1 }
 0x4af   :  { %v1070_v10 = vadd.f32 %v1069_v62, %v988_v25  ;;  %v1071_v2 = vpop.f32.mrb[9].mxu1 }
 0x4b0   :  { %v1072_v4 = vadd.f32 %v1071_v2, %v992_v24  ;;  %v1073_v29 = vpop.f32.mrb[10].mxu1 }
 0x4b1   :  { %v1076_v59 = vmax.f32 %v1070_v10, 0.0  ;;  %v1074_v0 = vpop.f32.mrb[11].mxu1 }
 0x4b2   :  { %v1077_v52 = vmax.f32 %v1072_v4, 0.0 }
 0x4b3   :  { %v1078_v45 = vpack.c.bf16 %v1076_v59, %v1076_v59 }
 0x4b4   :  { %v1079_v5 = vpack.c.bf16 %v1077_v52, %v1077_v52 }
 0x4b6   :  { %1316 = vmatprep.mubr.bf16.mxu0 %v1079_v5 }
 0x4b7   :  { %1317 = vmatmul.mubr.bf16.vlgmr.msra.gmra.mrb[32].mxu0 %v1078_v45 }
 0x58a   :  { %v1318_v43 = vpop.f32.mrb[32].mxu0 }
 0x58b   :  { %v1319_v14 = vadd.f32 %v1318_v43, %v1117_v61  ;;  %v1320_v16 = vpop.f32.mrb[33].mxu0 }
 0x58c   :  { %v1321_v17 = vadd.f32 %v1320_v16, %v1121_v9  ;;  %v1322_v12 = vpop.f32.mrb[34].mxu0 }
 0x58d   :  { %v1325_v18 = vmax.f32 %v1319_v14, 0.0  ;;  %v1323_v19 = vpop.f32.mrb[35].mxu0 }
 0x58e   :  { %v1326_v22 = vmax.f32 %v1321_v17, 0.0 }
 0x58f   :  { %v1327_v26 = vpack.c.bf16 %v1325_v18, %v1325_v18 }
 0x590   :  { %v1328_v23 = vpack.c.bf16 %v1326_v22, %v1326_v22 }
 0x592   :  { %1496 = vmatprep.mubr.bf16.mxu1 %v1328_v23 }
 0x593   :  { %1497 = vmatmul.mubr.bf16.vlgmr.msra.gmra.mrb[12].mxu1 %v1327_v26 }
 0x666   :  { %v1661_v8 = vpop.f32.mrb[12].mxu1 }
 0x667   :  { %v1662_v48 = vpop.f32.mrb[13].mxu1 }
 0x668   :  { %v1663_v50 = vadd.f32 %v1662_v48, %v1661_v8  ;;  %v1664_v21 = vpop.f32.mrb[14].mxu1 }
 0x669   :  { %v1665_v46 = vpop.f32.mrb[15].mxu1 }
 0x66a   :  { %v1499_v30 = vadd.f32 %v1663_v50, %v1584_v28 }
 0x66c   :  { %1505 = vst.msk [vmem:[#allocation3] sm:$0x3] %vm1504_vm6, %v1499_v30 }
 0x66d   :  { %1866 = shalt.err (!%p1863_p4)
}
 0x66e   :  { %s1867_s12 = scalar_lea.hbm %s2523_s13, 32 }
 0x66f   :  { %p1868_p5 = scmp.ne.s32.totalorder %s2523_s13, %s1867_s12  ;;  %p1871_p6 = scmp.lt.u32.totalorder %s1867_s12, %s2523_s13 }
 0x671   :  { %p1873_p7 = pnand %p1871_p6, %p1868_p5 }
 0x673   :  { %1876 = shalt.err (!%p1873_p7)
}
 0x674   :  { %1515 = dma.vmem_to_hbm [thread:$0]  %s1513_s0, 32, %s2523_s13, [#allocation4]  }
 0x675   :  { %1877 = dma.done.wait [#allocation4], 32  }
 0x676   :  { %1878 = vsyncadd [#allocation4], 4294967264 }
 0x677   :  { %1519 = vsyncpa [#allocation4], 1 }

</bundles_post_ra>
